<compile_context>
chip_gen: v5e
topology: v5e:2x2
jax: 0.10.0
libtpu: 0.0.40
codegen_flags: <defaults>
</compile_context>

<pallas_src>
import functools

import jax
import jax.numpy as jnp
from jax.experimental import pallas as pl
from jax.experimental.pallas import tpu as pltpu


_VMEM_LIMIT = 32 * 1024 * 1024   # raise v5e's 16 MiB scoped default; safe on v6e/v7x


def _round_up(v, m):
    return ((v + m - 1) // m) * m


def _pick_tm(m, tm_max=1024):
    """Row-tile size: large tiles for big M, >=2 grid steps (v7x megacore) when possible."""
    if m <= 8 or m % 8 != 0:
        return m                       # single full block (always a legal block shape)
    return min(tm_max, max(8, _round_up(m // 2, 8)))


def _compiler_params():
    return pltpu.CompilerParams(dimension_semantics=("parallel",),
                                vmem_limit_bytes=_VMEM_LIMIT)


# ----------------------------- Pallas kernels ------------------------------ #

def _gemm_bias_kernel(x_ref, w_ref, b_ref, o_ref, *, relu):
    """out = relu?( x @ w + bias ) — bf16 operands, f32 accumulation."""
    acc = jnp.dot(x_ref[...], w_ref[...], preferred_element_type=jnp.float32)
    acc = acc + b_ref[...]
    if relu:
        acc = jnp.maximum(acc, 0.0)
    o_ref[...] = acc.astype(o_ref.dtype)


def _gemm_bias_res_kernel(x_ref, w_ref, b_ref, r_ref, o_ref, *, relu):
    """out = relu?( x @ w + bias + residual )."""
    acc = jnp.dot(x_ref[...], w_ref[...], preferred_element_type=jnp.float32)
    acc = acc + b_ref[...] + r_ref[...].astype(jnp.float32)
    if relu:
        acc = jnp.maximum(acc, 0.0)
    o_ref[...] = acc.astype(o_ref.dtype)


def _gemm_dual_kernel(x_ref, w1_ref, b1_ref, wd_ref, bd_ref, o1_ref, od_ref):
    """Fused conv1x1(+ReLU) and downsample conv1x1 sharing a single read of x."""
    x = x_ref[...]
    a1 = jnp.dot(x, w1_ref[...], preferred_element_type=jnp.float32) + b1_ref[...]
    o1_ref[...] = jnp.maximum(a1, 0.0).astype(o1_ref.dtype)
    ad = jnp.dot(x, wd_ref[...], preferred_element_type=jnp.float32) + bd_ref[...]
    od_ref[...] = ad.astype(od_ref.dtype)


def _conv3x3_kernel(x_ref, w_ref, b_ref, o_ref, *, height, width):
    """3x3/s1/p1 conv of one image as 9 shifted GEMMs on a VMEM-resident slab.

    x_ref: (1, (H+2)*W + 2, Cin) — H-padded image, flattened row-major, with one
           zero guard cell at each end so every tap is a contiguous static slice.
    w_ref: (9, Cin, Cout) per-tap weights (BN scale already folded in).
    """
    hw = height * width
    col = jax.lax.broadcasted_iota(jnp.int32, (hw, 1), 0) % width
    acc = jnp.zeros((hw, w_ref.shape[-1]), jnp.float32)
    for ky in range(3):
        for kx in range(3):
            shift = ky * width + kx - 1
            slab = x_ref[0, 1 + shift:1 + shift + hw, :]        # (HW, Cin) bf16
            if kx != 1:                         # mask columns that wrapped across W
                xcol = col + (kx - 1)
                keep = jnp.logical_and(xcol >= 0, xcol < width)
                slab = jnp.where(keep, slab, jnp.zeros_like(slab))
            acc = acc + jnp.dot(slab, w_ref[ky * 3 + kx],
                                preferred_element_type=jnp.float32)
    acc = acc + b_ref[...]
    o_ref[0] = jnp.maximum(acc, 0.0).astype(o_ref.dtype)


def _maxpool_kernel(p_ref, o_ref):
    """p_ref: (9, tm, C) window taps; out = elementwise max over the 9 taps."""
    o_ref[...] = jnp.max(p_ref[...], axis=0)


# ----------------------------- Pallas wrappers ----------------------------- #

def fused_conv_gemm(x, w, bias, residual=None, relu=True,
                    out_dtype=jnp.bfloat16, tm_max=1024):
    """1x1-conv-as-GEMM with fused bias (+ optional residual) and ReLU.

    x: (M, K) bf16, w: (K, Cout) bf16 (BN folded), bias: (1, Cout) f32,
    residual: (M, Cout) bf16.  No host-side padding / slicing.
    """
    m, k = x.shape
    cout = w.shape[1]
    tm = _pick_tm(m, tm_max)
    grid = (pl.cdiv(m, tm),)
    x_spec = pl.BlockSpec((tm, k), lambda i: (i, 0))
    w_spec = pl.BlockSpec((k, cout), lambda i: (0, 0))
    b_spec = pl.BlockSpec((1, cout), lambda i: (0, 0))
    o_spec = pl.BlockSpec((tm, cout), lambda i: (i, 0))
    out_shape = jax.ShapeDtypeStruct((m, cout), out_dtype)

    if residual is None:
        return pl.pallas_call(
            functools.partial(_gemm_bias_kernel, relu=relu),
            out_shape=out_shape, grid=grid,
            in_specs=[x_spec, w_spec, b_spec],
            out_specs=o_spec, compiler_params=_compiler_params(),
        )(x, w, bias)
    return pl.pallas_call(
        functools.partial(_gemm_bias_res_kernel, relu=relu),
        out_shape=out_shape, grid=grid,
        in_specs=[x_spec, w_spec, b_spec, o_spec],
        out_specs=o_spec, compiler_params=_compiler_params(),
    )(x, w, bias, residual)


def fused_conv_gemm_dual(x, w1, b1, wd, bd, tm_max=1024):
    """Block-0 fusion: relu(x@w1+b1) and (x@wd+bd) with one HBM read of x."""
    m, k = x.shape
    c1, cd = w1.shape[1], wd.shape[1]
    tm = _pick_tm(m, tm_max)
    return pl.pallas_call(
        _gemm_dual_kernel,
        out_shape=(jax.ShapeDtypeStruct((m, c1), jnp.bfloat16),
                   jax.ShapeDtypeStruct((m, cd), jnp.bfloat16)),
        grid=(pl.cdiv(m, tm),),
        in_specs=[pl.BlockSpec((tm, k), lambda i: (i, 0)),
                  pl.BlockSpec((k, c1), lambda i: (0, 0)),
                  pl.BlockSpec((1, c1), lambda i: (0, 0)),
                  pl.BlockSpec((k, cd), lambda i: (0, 0)),
                  pl.BlockSpec((1, cd), lambda i: (0, 0))],
        out_specs=[pl.BlockSpec((tm, c1), lambda i: (i, 0)),
                   pl.BlockSpec((tm, cd), lambda i: (i, 0))],
        compiler_params=_compiler_params(),
    )(x, w1, b1, wd, bd)


def conv3x3_bn_relu(x_flat, w_taps, bias, n, height, width):
    """3x3/s1/p1 conv + folded BN + ReLU without materializing im2col in HBM."""
    c = x_flat.shape[1]
    cout = w_taps.shape[2]
    x = x_flat.reshape(n, height, width, c)
    x = jnp.pad(x, ((0, 0), (1, 1), (0, 0), (0, 0)))        # zero-pad H only
    x = x.reshape(n, (height + 2) * width, c)
    x = jnp.pad(x, ((0, 0), (1, 1), (0, 0)))                 # flat guard cells
    flat_len = (height + 2) * width + 2
    out = pl.pallas_call(
        functools.partial(_conv3x3_kernel, height=height, width=width),
        out_shape=jax.ShapeDtypeStruct((n, height * width, cout), jnp.bfloat16),
        grid=(n,),
        in_specs=[pl.BlockSpec((1, flat_len, c), lambda i: (i, 0, 0)),
                  pl.BlockSpec((9, c, cout), lambda i: (0, 0, 0)),
                  pl.BlockSpec((1, cout), lambda i: (0, 0))],
        out_specs=pl.BlockSpec((1, height * width, cout), lambda i: (i, 0, 0)),
        compiler_params=_compiler_params(),
    )(x, w_taps, bias)
    return out.reshape(n * height * width, cout)


def im2col(x, kh, kw, stride, pad):
    """x: (N, H, W, C) NHWC -> patches (N*OH*OW, kh*kw*C), plus OH, OW."""
    n, h, w, c = x.shape
    xp = jnp.pad(x, ((0, 0), (pad, pad), (pad, pad), (0, 0)))
    oh = (h + 2 * pad - kh) // stride + 1
    ow = (w + 2 * pad - kw) // stride + 1
    taps = [xp[:, ky:ky + stride * oh:stride, kx:kx + stride * ow:stride, :]
            for ky in range(kh) for kx in range(kw)]
    patches = jnp.stack(taps, axis=3)              # (N, OH, OW, kh*kw, C)
    return patches.reshape(n * oh * ow, kh * kw * c), oh, ow


def maxpool_3x3_s2_p1(x):
    """x: (N, H, W, C) NHWC bf16; MaxPool2d(kernel=3, stride=2, padding=1)."""
    n, h, w, c = x.shape
    oh = (h + 2 - 3) // 2 + 1
    ow = (w + 2 - 3) // 2 + 1
    xp = jnp.pad(x, ((0, 0), (1, 1), (1, 1), (0, 0)), constant_values=-jnp.inf)
    # TODO(synk): taps are still materialized 9x in HBM (bf16 halves the cost); a
    #             windowed in-kernel pool would remove the duplication entirely.
    taps = [xp[:, ky:ky + 2 * oh:2, kx:kx + 2 * ow:2, :]
            for ky in range(3) for kx in range(3)]
    patches = jnp.stack(taps, axis=0).reshape(9, n * oh * ow, c)
    m = n * oh * ow
    tm = _pick_tm(m, 512)
    out = pl.pallas_call(
        _maxpool_kernel,
        out_shape=jax.ShapeDtypeStruct((m, c), x.dtype),
        grid=(pl.cdiv(m, tm),),
        in_specs=[pl.BlockSpec((9, tm, c), lambda i: (0, i, 0))],
        out_specs=pl.BlockSpec((tm, c), lambda i: (i, 0)),
        compiler_params=_compiler_params(),
    )(patches)
    return out.reshape(n, oh, ow, c)


# -------------------------- parameters (synthetic) -------------------------- #

def _conv_w(key, kh, kw, cin, cout, std=0.05):
    return jax.random.normal(key, (kh, kw, cin, cout), jnp.float32) * std


def _bn_fold(key, c, eps=1e-5):
    k1, k2, k3, k4 = jax.random.split(key, 4)
    gamma = 1.0 + 0.1 * jax.random.normal(k1, (c,), jnp.float32)
    beta = 0.1 * jax.random.normal(k2, (c,), jnp.float32)
    mean = 0.1 * jax.random.normal(k3, (c,), jnp.float32)
    var = 0.5 + 0.5 * jnp.abs(jax.random.normal(k4, (c,), jnp.float32))
    scale = gamma / jnp.sqrt(var + eps)
    bias = beta - mean * scale
    return scale, bias


def _fold_conv_bn(key_w, key_bn, kh, kw, cin, cout):
    """Conv weight with BN scale folded in; returns (bf16 weight, f32 bias row)."""
    w = _conv_w(key_w, kh, kw, cin, cout)
    scale, bias = _bn_fold(key_bn, cout)
    return (w * scale).astype(jnp.bfloat16), bias.reshape(1, cout)


def init_params(key):
    keys = iter(jax.random.split(key, 64))
    p = {}
    # level_0: conv1 7x7/2 (3->64, no bias) + bn1 (folded) + relu
    wf, p['conv1_b'] = _fold_conv_bn(next(keys), next(keys), 7, 7, 3, 64)
    p['conv1_w'] = wf.reshape(7 * 7 * 3, 64)
    # level_1: maxpool + layer1 (3 Bottlenecks, 64->256) + Conv2d(256, 192, 1)
    layer1 = []
    in_c = 64
    for i in range(3):
        blk = {}
        wf, blk['b1'] = _fold_conv_bn(next(keys), next(keys), 1, 1, in_c, 64)
        blk['w1'] = wf.reshape(in_c, 64)
        wf, blk['b2'] = _fold_conv_bn(next(keys), next(keys), 3, 3, 64, 64)
        blk['w2'] = wf.reshape(9, 64, 64)                  # (ky*3+kx, cin, cout)
        wf, blk['b3'] = _fold_conv_bn(next(keys), next(keys), 1, 1, 64, 256)
        blk['w3'] = wf.reshape(64, 256)
        if i == 0:
            wf, blk['bd'] = _fold_conv_bn(next(keys), next(keys), 1, 1, in_c, 256)
            blk['wd'] = wf.reshape(in_c, 256)
        layer1.append(blk)
        in_c = 256
    p['layer1'] = layer1
    p['final_w'] = _conv_w(next(keys), 1, 1, 256, 192).reshape(256, 192).astype(jnp.bfloat16)
    p['final_b'] = (0.1 * jax.random.normal(next(keys), (192,), jnp.float32)).reshape(1, 192)
    return p


# --------------------------------- forward --------------------------------- #

def _bottleneck(feat, p, n, height, width, has_downsample):
    """Bottleneck on flattened NHWC activations: (N*H*W, Cin) -> (N*H*W, 256)."""
    if has_downsample:
        h1, identity = fused_conv_gemm_dual(feat, p['w1'], p['b1'], p['wd'], p['bd'])
    else:
        h1 = fused_conv_gemm(feat, p['w1'], p['b1'], relu=True)
        identity = feat
    h2 = conv3x3_bn_relu(h1, p['w2'], p['b2'], n, height, width)
    return fused_conv_gemm(h2, p['w3'], p['b3'], residual=identity, relu=True)


def resnet_context_forward(x_nchw, params):
    """Mirrors ResNetcontext.forward: returns [x_quarter] in NCHW (float32)."""
    x = jnp.transpose(x_nchw, (0, 2, 3, 1)).astype(jnp.bfloat16)   # -> NHWC bf16
    n = x.shape[0]

    # level_0: conv1(7x7, s2, p3, no bias) + bn1 + relu
    cols, oh, ow = im2col(x, 7, 7, 2, 3)
    y = fused_conv_gemm(cols, params['conv1_w'], params['conv1_b'], relu=True)
    x_half = y.reshape(n, oh, ow, 64)

    # level_1: maxpool(3, s2, p1) + layer1 (3 bottlenecks) + Conv2d(256, 192, 1)
    hp = maxpool_3x3_s2_p1(x_half)
    nb, h4, w4, _ = hp.shape
    feat = hp.reshape(nb * h4 * w4, 64)
    for i, blk in enumerate(params['layer1']):
        feat = _bottleneck(feat, blk, nb, h4, w4, has_downsample=(i == 0))
    y = fused_conv_gemm(feat, params['final_w'], params['final_b'],
                        relu=False, out_dtype=jnp.float32)
    x_quarter = y.reshape(nb, h4, w4, 192)
    return [jnp.transpose(x_quarter, (0, 3, 1, 2))]       # back to NCHW


# ----------------------------------- main ----------------------------------- #

if __name__ == "__main__":
    key = jax.random.PRNGKey(0)
    k_params, k_x = jax.random.split(key)
    params = init_params(k_params)

    # small shapes consistent with the module: NCHW image with 3 channels
    x = jax.random.normal(k_x, (2, 3, 16, 16), jnp.float32)

    fwd = jax.jit(resnet_context_forward)
    outputs = fwd(x, params)
    out = jax.block_until_ready(outputs[0])

    assert out.shape == (2, 192, 4, 4), out.shape
    assert out.dtype == jnp.float32
    assert bool(jnp.all(jnp.isfinite(out)))
    print("KERNEL_OK")
</pallas_src>

<mosaic_0001>
module attributes {stable_mosaic.version = 11 : i64} {
  func.func @_gemm_bias_kernel(%arg0: i32, %arg1: memref<64x147xbf16, #tpu.memory_space<vmem>>, %arg2: memref<147x64xbf16, #tpu.memory_space<vmem>>, %arg3: memref<1x64xf32, #tpu.memory_space<vmem>>, %arg4: memref<64x64xbf16, #tpu.memory_space<vmem>>) attributes {dimension_semantics = [#tpu.dimension_semantics<parallel>], iteration_bounds = array<i64: 2>, scalar_prefetch = 0 : i64, scratch_operands = 0 : i64, tpu.core_type = #tpu.core_type<tc>, window_params = [{transform_indices = @transform_0, window_bounds = array<i64: 64, 147>}, {pipeline_mode = #tpu.pipeline_mode<synchronous>, transform_indices = @transform_1, window_bounds = array<i64: 147, 64>}, {pipeline_mode = #tpu.pipeline_mode<synchronous>, transform_indices = @transform_2, window_bounds = array<i64: 1, 64>}, {transform_indices = @transform_3, window_bounds = array<i64: 64, 64>}]} {
    %c0 = arith.constant 0 : index
    %c0_0 = arith.constant 0 : index
    %0 = vector.load %arg1[%c0, %c0_0] : memref<64x147xbf16, #tpu.memory_space<vmem>>, vector<64x147xbf16>
    %c0_1 = arith.constant 0 : index
    %c0_2 = arith.constant 0 : index
    %1 = vector.load %arg2[%c0_1, %c0_2] : memref<147x64xbf16, #tpu.memory_space<vmem>>, vector<147x64xbf16>
    %cst = arith.constant dense<0.000000e+00> : vector<64x64xf32>
    %2 = tpu.matmul %0, %1, %cst {dimension_numbers = #tpu.dot_dimension_numbers<[1], [0], [0], [1], [0, 0, 1, 1], [], []>} : vector<64x147xbf16>, vector<147x64xbf16>, vector<64x64xf32> -> vector<64x64xf32>
    %c0_3 = arith.constant 0 : index
    %c0_4 = arith.constant 0 : index
    %3 = vector.load %arg3[%c0_3, %c0_4] : memref<1x64xf32, #tpu.memory_space<vmem>>, vector<1x64xf32>
    %4 = vector.broadcast %3 : vector<1x64xf32> to vector<64x64xf32>
    %5 = arith.addf %2, %4 : vector<64x64xf32>
    %cst_5 = arith.constant 0.000000e+00 : f32
    %6 = vector.broadcast %cst_5 : f32 to vector<64x64xf32>
    %7 = arith.maximumf %5, %6 : vector<64x64xf32>
    %8 = arith.truncf %7 : vector<64x64xf32> to vector<64x64xbf16>
    %c0_6 = arith.constant 0 : index
    %c0_7 = arith.constant 0 : index
    %9 = vector.load %arg4[%c0_6, %c0_7] : memref<64x64xbf16, #tpu.memory_space<vmem>>, vector<64x64xbf16>
    tpu.vector_store %arg4[%c0_6, %c0_7], %8 {strides = array<i32>} : memref<64x64xbf16, #tpu.memory_space<vmem>>, vector<64x64xbf16>,
    return
  }
  func.func @transform_0(%arg0: i32) -> (i32, i32) {
    %c0_i32 = arith.constant 0 : i32
    %c0_i32_0 = arith.constant 0 : i32
    return %arg0, %c0_i32 : i32, i32
  }
  func.func @transform_1(%arg0: i32) -> (i32, i32) {
    %c0_i32 = arith.constant 0 : i32
    %c0_i32_0 = arith.constant 0 : i32
    %c0_i32_1 = arith.constant 0 : i32
    return %c0_i32, %c0_i32_0 : i32, i32
  }
  func.func @transform_2(%arg0: i32) -> (i32, i32) {
    %c0_i32 = arith.constant 0 : i32
    %c0_i32_0 = arith.constant 0 : i32
    %c0_i32_1 = arith.constant 0 : i32
    return %c0_i32, %c0_i32_0 : i32, i32
  }
  func.func @transform_3(%arg0: i32) -> (i32, i32) {
    %c0_i32 = arith.constant 0 : i32
    %c0_i32_0 = arith.constant 0 : i32
    return %arg0, %c0_i32 : i32, i32
  }
}

module attributes {stable_mosaic.version = 11 : i64} {
  func.func @_maxpool_kernel(%arg0: i32, %arg1: memref<9x16x64xbf16, #tpu.memory_space<vmem>>, %arg2: memref<16x64xbf16, #tpu.memory_space<vmem>>) attributes {dimension_semantics = [#tpu.dimension_semantics<parallel>], iteration_bounds = array<i64: 2>, scalar_prefetch = 0 : i64, scratch_operands = 0 : i64, tpu.core_type = #tpu.core_type<tc>, window_params = [{transform_indices = @transform_0, window_bounds = array<i64: 9, 16, 64>}, {transform_indices = @transform_1, window_bounds = array<i64: 16, 64>}]} {
    %c0 = arith.constant 0 : index
    %c0_0 = arith.constant 0 : index
    %c0_1 = arith.constant 0 : index
    %0 = vector.load %arg1[%c0, %c0_0, %c0_1] : memref<9x16x64xbf16, #tpu.memory_space<vmem>>, vector<9x16x64xbf16>
    %cst = arith.constant dense<0xFF80> : vector<16x64xbf16>
    %1 = vector.multi_reduction <maximumf>, %0, %cst [0] : vector<9x16x64xbf16> to vector<16x64xbf16>
    %c0_2 = arith.constant 0 : index
    %c0_3 = arith.constant 0 : index
    %2 = vector.load %arg2[%c0_2, %c0_3] : memref<16x64xbf16, #tpu.memory_space<vmem>>, vector<16x64xbf16>
    tpu.vector_store %arg2[%c0_2, %c0_3], %1 {strides = array<i32>} : memref<16x64xbf16, #tpu.memory_space<vmem>>, vector<16x64xbf16>,
    return
  }
  func.func @transform_0(%arg0: i32) -> (i32, i32, i32) {
    %c0_i32 = arith.constant 0 : i32
    %c0_i32_0 = arith.constant 0 : i32
    %c0_i32_1 = arith.constant 0 : i32
    return %c0_i32, %arg0, %c0_i32_0 : i32, i32, i32
  }
  func.func @transform_1(%arg0: i32) -> (i32, i32) {
    %c0_i32 = arith.constant 0 : i32
    %c0_i32_0 = arith.constant 0 : i32
    return %arg0, %c0_i32 : i32, i32
  }
}

module attributes {stable_mosaic.version = 11 : i64} {
  func.func @_gemm_dual_kernel(%arg0: i32, %arg1: memref<16x64xbf16, #tpu.memory_space<vmem>>, %arg2: memref<64x64xbf16, #tpu.memory_space<vmem>>, %arg3: memref<1x64xf32, #tpu.memory_space<vmem>>, %arg4: memref<64x256xbf16, #tpu.memory_space<vmem>>, %arg5: memref<1x256xf32, #tpu.memory_space<vmem>>, %arg6: memref<16x64xbf16, #tpu.memory_space<vmem>>, %arg7: memref<16x256xbf16, #tpu.memory_space<vmem>>) attributes {dimension_semantics = [#tpu.dimension_semantics<parallel>], iteration_bounds = array<i64: 2>, scalar_prefetch = 0 : i64, scratch_operands = 0 : i64, tpu.core_type = #tpu.core_type<tc>, window_params = [{transform_indices = @transform_0, window_bounds = array<i64: 16, 64>}, {pipeline_mode = #tpu.pipeline_mode<synchronous>, transform_indices = @transform_1, window_bounds = array<i64: 64, 64>}, {pipeline_mode = #tpu.pipeline_mode<synchronous>, transform_indices = @transform_2, window_bounds = array<i64: 1, 64>}, {pipeline_mode = #tpu.pipeline_mode<synchronous>, transform_indices = @transform_3, window_bounds = array<i64: 64, 256>}, {pipeline_mode = #tpu.pipeline_mode<synchronous>, transform_indices = @transform_4, window_bounds = array<i64: 1, 256>}, {transform_indices = @transform_5, window_bounds = array<i64: 16, 64>}, {transform_indices = @transform_6, window_bounds = array<i64: 16, 256>}]} {
    %c0 = arith.constant 0 : index
    %c0_0 = arith.constant 0 : index
    %0 = vector.load %arg1[%c0, %c0_0] : memref<16x64xbf16, #tpu.memory_space<vmem>>, vector<16x64xbf16>
    %c0_1 = arith.constant 0 : index
    %c0_2 = arith.constant 0 : index
    %1 = vector.load %arg2[%c0_1, %c0_2] : memref<64x64xbf16, #tpu.memory_space<vmem>>, vector<64x64xbf16>
    %cst = arith.constant dense<0.000000e+00> : vector<16x64xf32>
    %2 = tpu.matmul %0, %1, %cst {dimension_numbers = #tpu.dot_dimension_numbers<[1], [0], [0], [1], [0, 0, 1, 1], [], []>} : vector<16x64xbf16>, vector<64x64xbf16>, vector<16x64xf32> -> vector<16x64xf32>
    %c0_3 = arith.constant 0 : index
    %c0_4 = arith.constant 0 : index
    %3 = vector.load %arg3[%c0_3, %c0_4] : memref<1x64xf32, #tpu.memory_space<vmem>>, vector<1x64xf32>
    %4 = vector.broadcast %3 : vector<1x64xf32> to vector<16x64xf32>
    %5 = arith.addf %2, %4 : vector<16x64xf32>
    %cst_5 = arith.constant 0.000000e+00 : f32
    %6 = vector.broadcast %cst_5 : f32 to vector<16x64xf32>
    %7 = arith.maximumf %5, %6 : vector<16x64xf32>
    %8 = arith.truncf %7 : vector<16x64xf32> to vector<16x64xbf16>
    %c0_6 = arith.constant 0 : index
    %c0_7 = arith.constant 0 : index
    %9 = vector.load %arg6[%c0_6, %c0_7] : memref<16x64xbf16, #tpu.memory_space<vmem>>, vector<16x64xbf16>
    tpu.vector_store %arg6[%c0_6, %c0_7], %8 {strides = array<i32>} : memref<16x64xbf16, #tpu.memory_space<vmem>>, vector<16x64xbf16>,
    %c0_8 = arith.constant 0 : index
    %c0_9 = arith.constant 0 : index
    %10 = vector.load %arg4[%c0_8, %c0_9] : memref<64x256xbf16, #tpu.memory_space<vmem>>, vector<64x256xbf16>
    %cst_10 = arith.constant dense<0.000000e+00> : vector<16x256xf32>
    %11 = tpu.matmul %0, %10, %cst_10 {dimension_numbers = #tpu.dot_dimension_numbers<[1], [0], [0], [1], [0, 0, 1, 1], [], []>} : vector<16x64xbf16>, vector<64x256xbf16>, vector<16x256xf32> -> vector<16x256xf32>
    %c0_11 = arith.constant 0 : index
    %c0_12 = arith.constant 0 : index
    %12 = vector.load %arg5[%c0_11, %c0_12] : memref<1x256xf32, #tpu.memory_space<vmem>>, vector<1x256xf32>
    %13 = vector.broadcast %12 : vector<1x256xf32> to vector<16x256xf32>
    %14 = arith.addf %11, %13 : vector<16x256xf32>
    %15 = arith.truncf %14 : vector<16x256xf32> to vector<16x256xbf16>
    %c0_13 = arith.constant 0 : index
    %c0_14 = arith.constant 0 : index
    %16 = vector.load %arg7[%c0_13, %c0_14] : memref<16x256xbf16, #tpu.memory_space<vmem>>, vector<16x256xbf16>
    tpu.vector_store %arg7[%c0_13, %c0_14], %15 {strides = array<i32>} : memref<16x256xbf16, #tpu.memory_space<vmem>>, vector<16x256xbf16>,
    return
  }
  func.func @transform_0(%arg0: i32) -> (i32, i32) {
    %c0_i32 = arith.constant 0 : i32
    %c0_i32_0 = arith.constant 0 : i32
    return %arg0, %c0_i32 : i32, i32
  }
  func.func @transform_1(%arg0: i32) -> (i32, i32) {
    %c0_i32 = arith.constant 0 : i32
    %c0_i32_0 = arith.constant 0 : i32
    %c0_i32_1 = arith.constant 0 : i32
    return %c0_i32, %c0_i32_0 : i32, i32
  }
  func.func @transform_2(%arg0: i32) -> (i32, i32) {
    %c0_i32 = arith.constant 0 : i32
    %c0_i32_0 = arith.constant 0 : i32
    %c0_i32_1 = arith.constant 0 : i32
    return %c0_i32, %c0_i32_0 : i32, i32
  }
  func.func @transform_3(%arg0: i32) -> (i32, i32) {
    %c0_i32 = arith.constant 0 : i32
    %c0_i32_0 = arith.constant 0 : i32
    %c0_i32_1 = arith.constant 0 : i32
    return %c0_i32, %c0_i32_0 : i32, i32
  }
  func.func @transform_4(%arg0: i32) -> (i32, i32) {
    %c0_i32 = arith.constant 0 : i32
    %c0_i32_0 = arith.constant 0 : i32
    %c0_i32_1 = arith.constant 0 : i32
    return %c0_i32, %c0_i32_0 : i32, i32
  }
  func.func @transform_5(%arg0: i32) -> (i32, i32) {
    %c0_i32 = arith.constant 0 : i32
    %c0_i32_0 = arith.constant 0 : i32
    return %arg0, %c0_i32 : i32, i32
  }
  func.func @transform_6(%arg0: i32) -> (i32, i32) {
    %c0_i32 = arith.constant 0 : i32
    %c0_i32_0 = arith.constant 0 : i32
    return %arg0, %c0_i32 : i32, i32
  }
}

module attributes {stable_mosaic.version = 11 : i64} {
  func.func @_conv3x3_kernel(%arg0: i32, %arg1: memref<1x26x64xbf16, #tpu.memory_space<vmem>>, %arg2: memref<9x64x64xbf16, #tpu.memory_space<vmem>>, %arg3: memref<1x64xf32, #tpu.memory_space<vmem>>, %arg4: memref<1x16x64xbf16, #tpu.memory_space<vmem>>) attributes {dimension_semantics = [#tpu.dimension_semantics<parallel>], iteration_bounds = array<i64: 2>, scalar_prefetch = 0 : i64, scratch_operands = 0 : i64, tpu.core_type = #tpu.core_type<tc>, window_params = [{transform_indices = @transform_0, window_bounds = array<i64: 1, 26, 64>}, {pipeline_mode = #tpu.pipeline_mode<synchronous>, transform_indices = @transform_1, window_bounds = array<i64: 9, 64, 64>}, {pipeline_mode = #tpu.pipeline_mode<synchronous>, transform_indices = @transform_2, window_bounds = array<i64: 1, 64>}, {transform_indices = @transform_3, window_bounds = array<i64: 1, 16, 64>}]} {
    %0 = tpu.iota {dimensions = array<i32: 0>} : vector<16x1xi32>
    %c4_i32 = arith.constant 4 : i32
    %c0_i32 = arith.constant 0 : i32
    %1 = arith.cmpi eq, %c4_i32, %c0_i32 : i32
    %c1_i32 = arith.constant 1 : i32
    %2 = arith.select %1, %c1_i32, %c4_i32 : i32
    %3 = vector.broadcast %2 : i32 to vector<16x1xi32>
    %4 = arith.remsi %0, %3 : vector<16x1xi32>
    %c0_i32_0 = arith.constant 0 : i32
    %5 = vector.broadcast %c0_i32_0 : i32 to vector<16x1xi32>
    %6 = arith.cmpi ne, %4, %5 : vector<16x1xi32>
    %c0_i32_1 = arith.constant 0 : i32
    %7 = vector.broadcast %c0_i32_1 : i32 to vector<16x1xi32>
    %8 = arith.cmpi slt, %4, %7 : vector<16x1xi32>
    %c0_i32_2 = arith.constant 0 : i32
    %9 = arith.cmpi slt, %2, %c0_i32_2 : i32
    %10 = vector.broadcast %9 : i1 to vector<16x1xi1>
    %11 = vector.broadcast %10 : vector<16x1xi1> to vector<16x1xi1>
    %12 = arith.xori %8, %11 : vector<16x1xi1>
    %13 = arith.andi %12, %6 : vector<16x1xi1>
    %14 = vector.broadcast %2 : i32 to vector<16x1xi32>
    %15 = arith.addi %4, %14 : vector<16x1xi32>
    %16 = arith.select %13, %15, %4 : vector<16x1xi1>, vector<16x1xi32>
    %cst = arith.constant 0.000000e+00 : f32
    %17 = vector.broadcast %cst : f32 to vector<16x64xf32>
    %c0 = arith.constant 0 : index
    %c0_3 = arith.constant 0 : index
    %c0_4 = arith.constant 0 : index
    %18 = vector.load %arg1[%c0, %c0_3, %c0_4] : memref<1x26x64xbf16, #tpu.memory_space<vmem>>, vector<1x16x64xbf16>
    %19 = vector.shape_cast %18 : vector<1x16x64xbf16> to vector<16x64xbf16>
    %c-1_i32 = arith.constant -1 : i32
    %20 = vector.broadcast %c-1_i32 : i32 to vector<16x1xi32>
    %21 = arith.addi %16, %20 : vector<16x1xi32>
    %c0_i32_5 = arith.constant 0 : i32
    %22 = vector.broadcast %c0_i32_5 : i32 to vector<16x1xi32>
    %23 = arith.cmpi sge, %21, %22 : vector<16x1xi32>
    %c4_i32_6 = arith.constant 4 : i32
    %24 = vector.broadcast %c4_i32_6 : i32 to vector<16x1xi32>
    %25 = arith.cmpi slt, %21, %24 : vector<16x1xi32>
    %26 = arith.andi %23, %25 : vector<16x1xi1>
    %cst_7 = arith.constant 0.000000e+00 : bf16
    %27 = vector.broadcast %cst_7 : bf16 to vector<16x64xbf16>
    %28 = vector.shape_cast %26 : vector<16x1xi1> to vector<16x1xi1>
    %29 = vector.broadcast %28 : vector<16x1xi1> to vector<16x64xi1>
    %30 = arith.select %29, %19, %27 : vector<16x64xi1>, vector<16x64xbf16>
    %c0_8 = arith.constant 0 : index
    %c0_9 = arith.constant 0 : index
    %c0_10 = arith.constant 0 : index
    %31 = vector.load %arg2[%c0_8, %c0_9, %c0_10] : memref<9x64x64xbf16, #tpu.memory_space<vmem>>, vector<1x64x64xbf16>
    %32 = vector.shape_cast %31 : vector<1x64x64xbf16> to vector<64x64xbf16>
    %cst_11 = arith.constant dense<0.000000e+00> : vector<16x64xf32>
    %33 = tpu.matmul %30, %32, %cst_11 {dimension_numbers = #tpu.dot_dimension_numbers<[1], [0], [0], [1], [0, 0, 1, 1], [], []>} : vector<16x64xbf16>, vector<64x64xbf16>, vector<16x64xf32> -> vector<16x64xf32>
    %34 = arith.addf %17, %33 : vector<16x64xf32>
    %c0_12 = arith.constant 0 : index
    %c1 = arith.constant 1 : index
    %c0_13 = arith.constant 0 : index
    %35 = vector.load %arg1[%c0_12, %c1, %c0_13] : memref<1x26x64xbf16, #tpu.memory_space<vmem>>, vector<1x16x64xbf16>
    %36 = vector.shape_cast %35 : vector<1x16x64xbf16> to vector<16x64xbf16>
    %c1_14 = arith.constant 1 : index
    %c0_15 = arith.constant 0 : index
    %c0_16 = arith.constant 0 : index
    %37 = vector.load %arg2[%c1_14, %c0_15, %c0_16] : memref<9x64x64xbf16, #tpu.memory_space<vmem>>, vector<1x64x64xbf16>
    %38 = vector.shape_cast %37 : vector<1x64x64xbf16> to vector<64x64xbf16>
    %cst_17 = arith.constant dense<0.000000e+00> : vector<16x64xf32>
    %39 = tpu.matmul %36, %38, %cst_17 {dimension_numbers = #tpu.dot_dimension_numbers<[1], [0], [0], [1], [0, 0, 1, 1], [], []>} : vector<16x64xbf16>, vector<64x64xbf16>, vector<16x64xf32> -> vector<16x64xf32>
    %40 = arith.addf %34, %39 : vector<16x64xf32>
    %c0_18 = arith.constant 0 : index
    %c2 = arith.constant 2 : index
    %c0_19 = arith.constant 0 : index
    %41 = vector.load %arg1[%c0_18, %c2, %c0_19] : memref<1x26x64xbf16, #tpu.memory_space<vmem>>, vector<1x16x64xbf16>
    %42 = vector.shape_cast %41 : vector<1x16x64xbf16> to vector<16x64xbf16>
    %c1_i32_20 = arith.constant 1 : i32
    %43 = vector.broadcast %c1_i32_20 : i32 to vector<16x1xi32>
    %44 = arith.addi %16, %43 : vector<16x1xi32>
    %c0_i32_21 = arith.constant 0 : i32
    %45 = vector.broadcast %c0_i32_21 : i32 to vector<16x1xi32>
    %46 = arith.cmpi sge, %44, %45 : vector<16x1xi32>
    %c4_i32_22 = arith.constant 4 : i32
    %47 = vector.broadcast %c4_i32_22 : i32 to vector<16x1xi32>
    %48 = arith.cmpi slt, %44, %47 : vector<16x1xi32>
    %49 = arith.andi %46, %48 : vector<16x1xi1>
    %cst_23 = arith.constant 0.000000e+00 : bf16
    %50 = vector.broadcast %cst_23 : bf16 to vector<16x64xbf16>
    %51 = vector.shape_cast %49 : vector<16x1xi1> to vector<16x1xi1>
    %52 = vector.broadcast %51 : vector<16x1xi1> to vector<16x64xi1>
    %53 = arith.select %52, %42, %50 : vector<16x64xi1>, vector<16x64xbf16>
    %c2_24 = arith.constant 2 : index
    %c0_25 = arith.constant 0 : index
    %c0_26 = arith.constant 0 : index
    %54 = vector.load %arg2[%c2_24, %c0_25, %c0_26] : memref<9x64x64xbf16, #tpu.memory_space<vmem>>, vector<1x64x64xbf16>
    %55 = vector.shape_cast %54 : vector<1x64x64xbf16> to vector<64x64xbf16>
    %cst_27 = arith.constant dense<0.000000e+00> : vector<16x64xf32>
    %56 = tpu.matmul %53, %55, %cst_27 {dimension_numbers = #tpu.dot_dimension_numbers<[1], [0], [0], [1], [0, 0, 1, 1], [], []>} : vector<16x64xbf16>, vector<64x64xbf16>, vector<16x64xf32> -> vector<16x64xf32>
    %57 = arith.addf %40, %56 : vector<16x64xf32>
    %c0_28 = arith.constant 0 : index
    %c4 = arith.constant 4 : index
    %c0_29 = arith.constant 0 : index
    %58 = vector.load %arg1[%c0_28, %c4, %c0_29] : memref<1x26x64xbf16, #tpu.memory_space<vmem>>, vector<1x16x64xbf16>
    %59 = vector.shape_cast %58 : vector<1x16x64xbf16> to vector<16x64xbf16>
    %c-1_i32_30 = arith.constant -1 : i32
    %60 = vector.broadcast %c-1_i32_30 : i32 to vector<16x1xi32>
    %61 = arith.addi %16, %60 : vector<16x1xi32>
    %c0_i32_31 = arith.constant 0 : i32
    %62 = vector.broadcast %c0_i32_31 : i32 to vector<16x1xi32>
    %63 = arith.cmpi sge, %61, %62 : vector<16x1xi32>
    %c4_i32_32 = arith.constant 4 : i32
    %64 = vector.broadcast %c4_i32_32 : i32 to vector<16x1xi32>
    %65 = arith.cmpi slt, %61, %64 : vector<16x1xi32>
    %66 = arith.andi %63, %65 : vector<16x1xi1>
    %cst_33 = arith.constant 0.000000e+00 : bf16
    %67 = vector.broadcast %cst_33 : bf16 to vector<16x64xbf16>
    %68 = vector.shape_cast %66 : vector<16x1xi1> to vector<16x1xi1>
    %69 = vector.broadcast %68 : vector<16x1xi1> to vector<16x64xi1>
    %70 = arith.select %69, %59, %67 : vector<16x64xi1>, vector<16x64xbf16>
    %c3 = arith.constant 3 : index
    %c0_34 = arith.constant 0 : index
    %c0_35 = arith.constant 0 : index
    %71 = vector.load %arg2[%c3, %c0_34, %c0_35] : memref<9x64x64xbf16, #tpu.memory_space<vmem>>, vector<1x64x64xbf16>
    %72 = vector.shape_cast %71 : vector<1x64x64xbf16> to vector<64x64xbf16>
    %cst_36 = arith.constant dense<0.000000e+00> : vector<16x64xf32>
    %73 = tpu.matmul %70, %72, %cst_36 {dimension_numbers = #tpu.dot_dimension_numbers<[1], [0], [0], [1], [0, 0, 1, 1], [], []>} : vector<16x64xbf16>, vector<64x64xbf16>, vector<16x64xf32> -> vector<16x64xf32>
    %74 = arith.addf %57, %73 : vector<16x64xf32>
    %c0_37 = arith.constant 0 : index
    %c5 = arith.constant 5 : index
    %c0_38 = arith.constant 0 : index
    %75 = vector.load %arg1[%c0_37, %c5, %c0_38] : memref<1x26x64xbf16, #tpu.memory_space<vmem>>, vector<1x16x64xbf16>
    %76 = vector.shape_cast %75 : vector<1x16x64xbf16> to vector<16x64xbf16>
    %c4_39 = arith.constant 4 : index
    %c0_40 = arith.constant 0 : index
    %c0_41 = arith.constant 0 : index
    %77 = vector.load %arg2[%c4_39, %c0_40, %c0_41] : memref<9x64x64xbf16, #tpu.memory_space<vmem>>, vector<1x64x64xbf16>
    %78 = vector.shape_cast %77 : vector<1x64x64xbf16> to vector<64x64xbf16>
    %cst_42 = arith.constant dense<0.000000e+00> : vector<16x64xf32>
    %79 = tpu.matmul %76, %78, %cst_42 {dimension_numbers = #tpu.dot_dimension_numbers<[1], [0], [0], [1], [0, 0, 1, 1], [], []>} : vector<16x64xbf16>, vector<64x64xbf16>, vector<16x64xf32> -> vector<16x64xf32>
    %80 = arith.addf %74, %79 : vector<16x64xf32>
    %c0_43 = arith.constant 0 : index
    %c6 = arith.constant 6 : index
    %c0_44 = arith.constant 0 : index
    %81 = vector.load %arg1[%c0_43, %c6, %c0_44] : memref<1x26x64xbf16, #tpu.memory_space<vmem>>, vector<1x16x64xbf16>
    %82 = vector.shape_cast %81 : vector<1x16x64xbf16> to vector<16x64xbf16>
    %c1_i32_45 = arith.constant 1 : i32
    %83 = vector.broadcast %c1_i32_45 : i32 to vector<16x1xi32>
    %84 = arith.addi %16, %83 : vector<16x1xi32>
    %c0_i32_46 = arith.constant 0 : i32
    %85 = vector.broadcast %c0_i32_46 : i32 to vector<16x1xi32>
    %86 = arith.cmpi sge, %84, %85 : vector<16x1xi32>
    %c4_i32_47 = arith.constant 4 : i32
    %87 = vector.broadcast %c4_i32_47 : i32 to vector<16x1xi32>
    %88 = arith.cmpi slt, %84, %87 : vector<16x1xi32>
    %89 = arith.andi %86, %88 : vector<16x1xi1>
    %cst_48 = arith.constant 0.000000e+00 : bf16
    %90 = vector.broadcast %cst_48 : bf16 to vector<16x64xbf16>
    %91 = vector.shape_cast %89 : vector<16x1xi1> to vector<16x1xi1>
    %92 = vector.broadcast %91 : vector<16x1xi1> to vector<16x64xi1>
    %93 = arith.select %92, %82, %90 : vector<16x64xi1>, vector<16x64xbf16>
    %c5_49 = arith.constant 5 : index
    %c0_50 = arith.constant 0 : index
    %c0_51 = arith.constant 0 : index
    %94 = vector.load %arg2[%c5_49, %c0_50, %c0_51] : memref<9x64x64xbf16, #tpu.memory_space<vmem>>, vector<1x64x64xbf16>
    %95 = vector.shape_cast %94 : vector<1x64x64xbf16> to vector<64x64xbf16>
    %cst_52 = arith.constant dense<0.000000e+00> : vector<16x64xf32>
    %96 = tpu.matmul %93, %95, %cst_52 {dimension_numbers = #tpu.dot_dimension_numbers<[1], [0], [0], [1], [0, 0, 1, 1], [], []>} : vector<16x64xbf16>, vector<64x64xbf16>, vector<16x64xf32> -> vector<16x64xf32>
    %97 = arith.addf %80, %96 : vector<16x64xf32>
    %c0_53 = arith.constant 0 : index
    %c8 = arith.constant 8 : index
    %c0_54 = arith.constant 0 : index
    %98 = vector.load %arg1[%c0_53, %c8, %c0_54] : memref<1x26x64xbf16, #tpu.memory_space<vmem>>, vector<1x16x64xbf16>
    %99 = vector.shape_cast %98 : vector<1x16x64xbf16> to vector<16x64xbf16>
    %c-1_i32_55 = arith.constant -1 : i32
    %100 = vector.broadcast %c-1_i32_55 : i32 to vector<16x1xi32>
    %101 = arith.addi %16, %100 : vector<16x1xi32>
    %c0_i32_56 = arith.constant 0 : i32
    %102 = vector.broadcast %c0_i32_56 : i32 to vector<16x1xi32>
    %103 = arith.cmpi sge, %101, %102 : vector<16x1xi32>
    %c4_i32_57 = arith.constant 4 : i32
    %104 = vector.broadcast %c4_i32_57 : i32 to vector<16x1xi32>
    %105 = arith.cmpi slt, %101, %104 : vector<16x1xi32>
    %106 = arith.andi %103, %105 : vector<16x1xi1>
    %cst_58 = arith.constant 0.000000e+00 : bf16
    %107 = vector.broadcast %cst_58 : bf16 to vector<16x64xbf16>
    %108 = vector.shape_cast %106 : vector<16x1xi1> to vector<16x1xi1>
    %109 = vector.broadcast %108 : vector<16x1xi1> to vector<16x64xi1>
    %110 = arith.select %109, %99, %107 : vector<16x64xi1>, vector<16x64xbf16>
    %c6_59 = arith.constant 6 : index
    %c0_60 = arith.constant 0 : index
    %c0_61 = arith.constant 0 : index
    %111 = vector.load %arg2[%c6_59, %c0_60, %c0_61] : memref<9x64x64xbf16, #tpu.memory_space<vmem>>, vector<1x64x64xbf16>
    %112 = vector.shape_cast %111 : vector<1x64x64xbf16> to vector<64x64xbf16>
    %cst_62 = arith.constant dense<0.000000e+00> : vector<16x64xf32>
    %113 = tpu.matmul %110, %112, %cst_62 {dimension_numbers = #tpu.dot_dimension_numbers<[1], [0], [0], [1], [0, 0, 1, 1], [], []>} : vector<16x64xbf16>, vector<64x64xbf16>, vector<16x64xf32> -> vector<16x64xf32>
    %114 = arith.addf %97, %113 : vector<16x64xf32>
    %c0_63 = arith.constant 0 : index
    %c9 = arith.constant 9 : index
    %c0_64 = arith.constant 0 : index
    %115 = vector.load %arg1[%c0_63, %c9, %c0_64] : memref<1x26x64xbf16, #tpu.memory_space<vmem>>, vector<1x16x64xbf16>
    %116 = vector.shape_cast %115 : vector<1x16x64xbf16> to vector<16x64xbf16>
    %c7 = arith.constant 7 : index
    %c0_65 = arith.constant 0 : index
    %c0_66 = arith.constant 0 : index
    %117 = vector.load %arg2[%c7, %c0_65, %c0_66] : memref<9x64x64xbf16, #tpu.memory_space<vmem>>, vector<1x64x64xbf16>
    %118 = vector.shape_cast %117 : vector<1x64x64xbf16> to vector<64x64xbf16>
    %cst_67 = arith.constant dense<0.000000e+00> : vector<16x64xf32>
    %119 = tpu.matmul %116, %118, %cst_67 {dimension_numbers = #tpu.dot_dimension_numbers<[1], [0], [0], [1], [0, 0, 1, 1], [], []>} : vector<16x64xbf16>, vector<64x64xbf16>, vector<16x64xf32> -> vector<16x64xf32>
    %120 = arith.addf %114, %119 : vector<16x64xf32>
    %c0_68 = arith.constant 0 : index
    %c10 = arith.constant 10 : index
    %c0_69 = arith.constant 0 : index
    %121 = vector.load %arg1[%c0_68, %c10, %c0_69] : memref<1x26x64xbf16, #tpu.memory_space<vmem>>, vector<1x16x64xbf16>
    %122 = vector.shape_cast %121 : vector<1x16x64xbf16> to vector<16x64xbf16>
    %c1_i32_70 = arith.constant 1 : i32
    %123 = vector.broadcast %c1_i32_70 : i32 to vector<16x1xi32>
    %124 = arith.addi %16, %123 : vector<16x1xi32>
    %c0_i32_71 = arith.constant 0 : i32
    %125 = vector.broadcast %c0_i32_71 : i32 to vector<16x1xi32>
    %126 = arith.cmpi sge, %124, %125 : vector<16x1xi32>
    %c4_i32_72 = arith.constant 4 : i32
    %127 = vector.broadcast %c4_i32_72 : i32 to vector<16x1xi32>
    %128 = arith.cmpi slt, %124, %127 : vector<16x1xi32>
    %129 = arith.andi %126, %128 : vector<16x1xi1>
    %cst_73 = arith.constant 0.000000e+00 : bf16
    %130 = vector.broadcast %cst_73 : bf16 to vector<16x64xbf16>
    %131 = vector.shape_cast %129 : vector<16x1xi1> to vector<16x1xi1>
    %132 = vector.broadcast %131 : vector<16x1xi1> to vector<16x64xi1>
    %133 = arith.select %132, %122, %130 : vector<16x64xi1>, vector<16x64xbf16>
    %c8_74 = arith.constant 8 : index
    %c0_75 = arith.constant 0 : index
    %c0_76 = arith.constant 0 : index
    %134 = vector.load %arg2[%c8_74, %c0_75, %c0_76] : memref<9x64x64xbf16, #tpu.memory_space<vmem>>, vector<1x64x64xbf16>
    %135 = vector.shape_cast %134 : vector<1x64x64xbf16> to vector<64x64xbf16>
    %cst_77 = arith.constant dense<0.000000e+00> : vector<16x64xf32>
    %136 = tpu.matmul %133, %135, %cst_77 {dimension_numbers = #tpu.dot_dimension_numbers<[1], [0], [0], [1], [0, 0, 1, 1], [], []>} : vector<16x64xbf16>, vector<64x64xbf16>, vector<16x64xf32> -> vector<16x64xf32>
    %137 = arith.addf %120, %136 : vector<16x64xf32>
    %c0_78 = arith.constant 0 : index
    %c0_79 = arith.constant 0 : index
    %138 = vector.load %arg3[%c0_78, %c0_79] : memref<1x64xf32, #tpu.memory_space<vmem>>, vector<1x64xf32>
    %139 = vector.broadcast %138 : vector<1x64xf32> to vector<16x64xf32>
    %140 = arith.addf %137, %139 : vector<16x64xf32>
    %cst_80 = arith.constant 0.000000e+00 : f32
    %141 = vector.broadcast %cst_80 : f32 to vector<16x64xf32>
    %142 = arith.maximumf %140, %141 : vector<16x64xf32>
    %143 = arith.truncf %142 : vector<16x64xf32> to vector<16x64xbf16>
    %c0_81 = arith.constant 0 : index
    %c0_82 = arith.constant 0 : index
    %c0_83 = arith.constant 0 : index
    %144 = vector.load %arg4[%c0_81, %c0_82, %c0_83] : memref<1x16x64xbf16, #tpu.memory_space<vmem>>, vector<1x16x64xbf16>
    %145 = vector.shape_cast %144 : vector<1x16x64xbf16> to vector<16x64xbf16>
    %146 = vector.shape_cast %143 : vector<16x64xbf16> to vector<1x16x64xbf16>
    tpu.vector_store %arg4[%c0_81, %c0_82, %c0_83], %146 {strides = array<i32>} : memref<1x16x64xbf16, #tpu.memory_space<vmem>>, vector<1x16x64xbf16>,
    return
  }
  func.func @transform_0(%arg0: i32) -> (i32, i32, i32) {
    %c0_i32 = arith.constant 0 : i32
    %c0_i32_0 = arith.constant 0 : i32
    %c0_i32_1 = arith.constant 0 : i32
    return %arg0, %c0_i32, %c0_i32_0 : i32, i32, i32
  }
  func.func @transform_1(%arg0: i32) -> (i32, i32, i32) {
    %c0_i32 = arith.constant 0 : i32
    %c0_i32_0 = arith.constant 0 : i32
    %c0_i32_1 = arith.constant 0 : i32
    %c0_i32_2 = arith.constant 0 : i32
    return %c0_i32, %c0_i32_0, %c0_i32_1 : i32, i32, i32
  }
  func.func @transform_2(%arg0: i32) -> (i32, i32) {
    %c0_i32 = arith.constant 0 : i32
    %c0_i32_0 = arith.constant 0 : i32
    %c0_i32_1 = arith.constant 0 : i32
    return %c0_i32, %c0_i32_0 : i32, i32
  }
  func.func @transform_3(%arg0: i32) -> (i32, i32, i32) {
    %c0_i32 = arith.constant 0 : i32
    %c0_i32_0 = arith.constant 0 : i32
    %c0_i32_1 = arith.constant 0 : i32
    return %arg0, %c0_i32, %c0_i32_0 : i32, i32, i32
  }
}

module attributes {stable_mosaic.version = 11 : i64} {
  func.func @_gemm_bias_res_kernel(%arg0: i32, %arg1: memref<16x64xbf16, #tpu.memory_space<vmem>>, %arg2: memref<64x256xbf16, #tpu.memory_space<vmem>>, %arg3: memref<1x256xf32, #tpu.memory_space<vmem>>, %arg4: memref<16x256xbf16, #tpu.memory_space<vmem>>, %arg5: memref<16x256xbf16, #tpu.memory_space<vmem>>) attributes {dimension_semantics = [#tpu.dimension_semantics<parallel>], iteration_bounds = array<i64: 2>, scalar_prefetch = 0 : i64, scratch_operands = 0 : i64, tpu.core_type = #tpu.core_type<tc>, window_params = [{transform_indices = @transform_0, window_bounds = array<i64: 16, 64>}, {pipeline_mode = #tpu.pipeline_mode<synchronous>, transform_indices = @transform_1, window_bounds = array<i64: 64, 256>}, {pipeline_mode = #tpu.pipeline_mode<synchronous>, transform_indices = @transform_2, window_bounds = array<i64: 1, 256>}, {transform_indices = @transform_3, window_bounds = array<i64: 16, 256>}, {transform_indices = @transform_4, window_bounds = array<i64: 16, 256>}]} {
    %c0 = arith.constant 0 : index
    %c0_0 = arith.constant 0 : index
    %0 = vector.load %arg1[%c0, %c0_0] : memref<16x64xbf16, #tpu.memory_space<vmem>>, vector<16x64xbf16>
    %c0_1 = arith.constant 0 : index
    %c0_2 = arith.constant 0 : index
    %1 = vector.load %arg2[%c0_1, %c0_2] : memref<64x256xbf16, #tpu.memory_space<vmem>>, vector<64x256xbf16>
    %cst = arith.constant dense<0.000000e+00> : vector<16x256xf32>
    %2 = tpu.matmul %0, %1, %cst {dimension_numbers = #tpu.dot_dimension_numbers<[1], [0], [0], [1], [0, 0, 1, 1], [], []>} : vector<16x64xbf16>, vector<64x256xbf16>, vector<16x256xf32> -> vector<16x256xf32>
    %c0_3 = arith.constant 0 : index
    %c0_4 = arith.constant 0 : index
    %3 = vector.load %arg3[%c0_3, %c0_4] : memref<1x256xf32, #tpu.memory_space<vmem>>, vector<1x256xf32>
    %4 = vector.broadcast %3 : vector<1x256xf32> to vector<16x256xf32>
    %5 = arith.addf %2, %4 : vector<16x256xf32>
    %c0_5 = arith.constant 0 : index
    %c0_6 = arith.constant 0 : index
    %6 = vector.load %arg4[%c0_5, %c0_6] : memref<16x256xbf16, #tpu.memory_space<vmem>>, vector<16x256xbf16>
    %7 = arith.extf %6 : vector<16x256xbf16> to vector<16x256xf32>
    %8 = arith.addf %5, %7 : vector<16x256xf32>
    %cst_7 = arith.constant 0.000000e+00 : f32
    %9 = vector.broadcast %cst_7 : f32 to vector<16x256xf32>
    %10 = arith.maximumf %8, %9 : vector<16x256xf32>
    %11 = arith.truncf %10 : vector<16x256xf32> to vector<16x256xbf16>
    %c0_8 = arith.constant 0 : index
    %c0_9 = arith.constant 0 : index
    %12 = vector.load %arg5[%c0_8, %c0_9] : memref<16x256xbf16, #tpu.memory_space<vmem>>, vector<16x256xbf16>
    tpu.vector_store %arg5[%c0_8, %c0_9], %11 {strides = array<i32>} : memref<16x256xbf16, #tpu.memory_space<vmem>>, vector<16x256xbf16>,
    return
  }
  func.func @transform_0(%arg0: i32) -> (i32, i32) {
    %c0_i32 = arith.constant 0 : i32
    %c0_i32_0 = arith.constant 0 : i32
    return %arg0, %c0_i32 : i32, i32
  }
  func.func @transform_1(%arg0: i32) -> (i32, i32) {
    %c0_i32 = arith.constant 0 : i32
    %c0_i32_0 = arith.constant 0 : i32
    %c0_i32_1 = arith.constant 0 : i32
    return %c0_i32, %c0_i32_0 : i32, i32
  }
  func.func @transform_2(%arg0: i32) -> (i32, i32) {
    %c0_i32 = arith.constant 0 : i32
    %c0_i32_0 = arith.constant 0 : i32
    %c0_i32_1 = arith.constant 0 : i32
    return %c0_i32, %c0_i32_0 : i32, i32
  }
  func.func @transform_3(%arg0: i32) -> (i32, i32) {
    %c0_i32 = arith.constant 0 : i32
    %c0_i32_0 = arith.constant 0 : i32
    return %arg0, %c0_i32 : i32, i32
  }
  func.func @transform_4(%arg0: i32) -> (i32, i32) {
    %c0_i32 = arith.constant 0 : i32
    %c0_i32_0 = arith.constant 0 : i32
    return %arg0, %c0_i32 : i32, i32
  }
}

module attributes {stable_mosaic.version = 11 : i64} {
  func.func @_gemm_bias_kernel(%arg0: i32, %arg1: memref<16x256xbf16, #tpu.memory_space<vmem>>, %arg2: memref<256x64xbf16, #tpu.memory_space<vmem>>, %arg3: memref<1x64xf32, #tpu.memory_space<vmem>>, %arg4: memref<16x64xbf16, #tpu.memory_space<vmem>>) attributes {dimension_semantics = [#tpu.dimension_semantics<parallel>], iteration_bounds = array<i64: 2>, scalar_prefetch = 0 : i64, scratch_operands = 0 : i64, tpu.core_type = #tpu.core_type<tc>, window_params = [{transform_indices = @transform_0, window_bounds = array<i64: 16, 256>}, {pipeline_mode = #tpu.pipeline_mode<synchronous>, transform_indices = @transform_1, window_bounds = array<i64: 256, 64>}, {pipeline_mode = #tpu.pipeline_mode<synchronous>, transform_indices = @transform_2, window_bounds = array<i64: 1, 64>}, {transform_indices = @transform_3, window_bounds = array<i64: 16, 64>}]} {
    %c0 = arith.constant 0 : index
    %c0_0 = arith.constant 0 : index
    %0 = vector.load %arg1[%c0, %c0_0] : memref<16x256xbf16, #tpu.memory_space<vmem>>, vector<16x256xbf16>
    %c0_1 = arith.constant 0 : index
    %c0_2 = arith.constant 0 : index
    %1 = vector.load %arg2[%c0_1, %c0_2] : memref<256x64xbf16, #tpu.memory_space<vmem>>, vector<256x64xbf16>
    %cst = arith.constant dense<0.000000e+00> : vector<16x64xf32>
    %2 = tpu.matmul %0, %1, %cst {dimension_numbers = #tpu.dot_dimension_numbers<[1], [0], [0], [1], [0, 0, 1, 1], [], []>} : vector<16x256xbf16>, vector<256x64xbf16>, vector<16x64xf32> -> vector<16x64xf32>
    %c0_3 = arith.constant 0 : index
    %c0_4 = arith.constant 0 : index
    %3 = vector.load %arg3[%c0_3, %c0_4] : memref<1x64xf32, #tpu.memory_space<vmem>>, vector<1x64xf32>
    %4 = vector.broadcast %3 : vector<1x64xf32> to vector<16x64xf32>
    %5 = arith.addf %2, %4 : vector<16x64xf32>
    %cst_5 = arith.constant 0.000000e+00 : f32
    %6 = vector.broadcast %cst_5 : f32 to vector<16x64xf32>
    %7 = arith.maximumf %5, %6 : vector<16x64xf32>
    %8 = arith.truncf %7 : vector<16x64xf32> to vector<16x64xbf16>
    %c0_6 = arith.constant 0 : index
    %c0_7 = arith.constant 0 : index
    %9 = vector.load %arg4[%c0_6, %c0_7] : memref<16x64xbf16, #tpu.memory_space<vmem>>, vector<16x64xbf16>
    tpu.vector_store %arg4[%c0_6, %c0_7], %8 {strides = array<i32>} : memref<16x64xbf16, #tpu.memory_space<vmem>>, vector<16x64xbf16>,
    return
  }
  func.func @transform_0(%arg0: i32) -> (i32, i32) {
    %c0_i32 = arith.constant 0 : i32
    %c0_i32_0 = arith.constant 0 : i32
    return %arg0, %c0_i32 : i32, i32
  }
  func.func @transform_1(%arg0: i32) -> (i32, i32) {
    %c0_i32 = arith.constant 0 : i32
    %c0_i32_0 = arith.constant 0 : i32
    %c0_i32_1 = arith.constant 0 : i32
    return %c0_i32, %c0_i32_0 : i32, i32
  }
  func.func @transform_2(%arg0: i32) -> (i32, i32) {
    %c0_i32 = arith.constant 0 : i32
    %c0_i32_0 = arith.constant 0 : i32
    %c0_i32_1 = arith.constant 0 : i32
    return %c0_i32, %c0_i32_0 : i32, i32
  }
  func.func @transform_3(%arg0: i32) -> (i32, i32) {
    %c0_i32 = arith.constant 0 : i32
    %c0_i32_0 = arith.constant 0 : i32
    return %arg0, %c0_i32 : i32, i32
  }
}

module attributes {stable_mosaic.version = 11 : i64} {
  func.func @_gemm_bias_kernel(%arg0: i32, %arg1: memref<16x256xbf16, #tpu.memory_space<vmem>>, %arg2: memref<256x192xbf16, #tpu.memory_space<vmem>>, %arg3: memref<1x192xf32, #tpu.memory_space<vmem>>, %arg4: memref<16x192xf32, #tpu.memory_space<vmem>>) attributes {dimension_semantics = [#tpu.dimension_semantics<parallel>], iteration_bounds = array<i64: 2>, scalar_prefetch = 0 : i64, scratch_operands = 0 : i64, tpu.core_type = #tpu.core_type<tc>, window_params = [{transform_indices = @transform_0, window_bounds = array<i64: 16, 256>}, {pipeline_mode = #tpu.pipeline_mode<synchronous>, transform_indices = @transform_1, window_bounds = array<i64: 256, 192>}, {pipeline_mode = #tpu.pipeline_mode<synchronous>, transform_indices = @transform_2, window_bounds = array<i64: 1, 192>}, {transform_indices = @transform_3, window_bounds = array<i64: 16, 192>}]} {
    %c0 = arith.constant 0 : index
    %c0_0 = arith.constant 0 : index
    %0 = vector.load %arg1[%c0, %c0_0] : memref<16x256xbf16, #tpu.memory_space<vmem>>, vector<16x256xbf16>
    %c0_1 = arith.constant 0 : index
    %c0_2 = arith.constant 0 : index
    %1 = vector.load %arg2[%c0_1, %c0_2] : memref<256x192xbf16, #tpu.memory_space<vmem>>, vector<256x192xbf16>
    %cst = arith.constant dense<0.000000e+00> : vector<16x192xf32>
    %2 = tpu.matmul %0, %1, %cst {dimension_numbers = #tpu.dot_dimension_numbers<[1], [0], [0], [1], [0, 0, 1, 1], [], []>} : vector<16x256xbf16>, vector<256x192xbf16>, vector<16x192xf32> -> vector<16x192xf32>
    %c0_3 = arith.constant 0 : index
    %c0_4 = arith.constant 0 : index
    %3 = vector.load %arg3[%c0_3, %c0_4] : memref<1x192xf32, #tpu.memory_space<vmem>>, vector<1x192xf32>
    %4 = vector.broadcast %3 : vector<1x192xf32> to vector<16x192xf32>
    %5 = arith.addf %2, %4 : vector<16x192xf32>
    %c0_5 = arith.constant 0 : index
    %c0_6 = arith.constant 0 : index
    %6 = vector.load %arg4[%c0_5, %c0_6] : memref<16x192xf32, #tpu.memory_space<vmem>>, vector<16x192xf32>
    tpu.vector_store %arg4[%c0_5, %c0_6], %5 {strides = array<i32>} : memref<16x192xf32, #tpu.memory_space<vmem>>, vector<16x192xf32>,
    return
  }
  func.func @transform_0(%arg0: i32) -> (i32, i32) {
    %c0_i32 = arith.constant 0 : i32
    %c0_i32_0 = arith.constant 0 : i32
    return %arg0, %c0_i32 : i32, i32
  }
  func.func @transform_1(%arg0: i32) -> (i32, i32) {
    %c0_i32 = arith.constant 0 : i32
    %c0_i32_0 = arith.constant 0 : i32
    %c0_i32_1 = arith.constant 0 : i32
    return %c0_i32, %c0_i32_0 : i32, i32
  }
  func.func @transform_2(%arg0: i32) -> (i32, i32) {
    %c0_i32 = arith.constant 0 : i32
    %c0_i32_0 = arith.constant 0 : i32
    %c0_i32_1 = arith.constant 0 : i32
    return %c0_i32, %c0_i32_0 : i32, i32
  }
  func.func @transform_3(%arg0: i32) -> (i32, i32) {
    %c0_i32 = arith.constant 0 : i32
    %c0_i32_0 = arith.constant 0 : i32
    return %arg0, %c0_i32 : i32, i32
  }
}

</mosaic_0001>

<bundles_post_ra>
// kernel: resnet_context_forward.12
= control target key start
LH: loop header
LB: loop body
LE: loop exit
PB: predicated region body
PF: predicated region fallthrough
CT: control target
= control target key end

     0   :  { %s612_s12 = smov 0   ;;  %s706_s0 = inlined_call_operand.vmem [shape: bf16[128,147], index: 0, kind: input, shape index: {}]   ;;  %s707_s1 = inlined_call_operand.vmem [shape: bf16[147,64], index: 1, kind: input, shape index: {}]   ;;  %s708_s2 = inlined_call_operand.vmem [shape: f32[1,64], index: 2, kind: input, shape index: {}]   ;;  %s709_s3 = inlined_call_operand.vmem [shape: bf16[128,64], index: 3, kind: output, shape index: {}]  }
   0x1 LB: > { %s461_s13 = sadd.s32 4294967295, %s589_s12   ;;  %p465_p0 = scmp.ge.s32.totalorder %s589_s12, 1  ;;  %s589_s12 = sphi %s612_s12, %s13_s12  }
   0x2   : > { %p139_p1 = scmp.lt.s32.totalorder %s589_s12, 3 }
   0x4   : > { %p140_p2 = pnand %p465_p0, %p139_p1 }
   0x5   : > { %s466_s18 = sshll.u32 (!%p140_p2), %s461_s13, 3 }
   0x6   : > { %143 = sbr.rel (%p140_p2) target bundleno = 208 (0xd0), region = 32  ;;  %p165_p3 = scmp.lt.s32.totalorder (!%p140_p2), %s466_s18, 15 }
   0xb   : > { %v561_v0 = vld [vmem:[%s707_s1 + $0x38] sm:$0xff]  ;;  %v204_v1 = vld [vmem:[%s707_s1 + $0x48] sm:$0x3]  ;;  %vm315_vm0 = vcmask 1040384   ;;  %vm316_vm1 = vcmask 1041408   ;;  %v560_v3 = vld [vmem:[%s707_s1 + $0x30] sm:$0xff] }
   0xc   : > { %v282_v2 = vunpack.c.l.b16 %v204_v1  ;;  %322 = vmatpush.bf16.msra.mxu0 %v561_v0  ;;  %563 = vmatpush.bf16.msra.mxu2 %v561_v0  ;;  %v591_v4 = vmov 65535   ;;  %s711_s18 = smov (!%p165_p3, %s466_s18), 15  ;;  %v559_v9 = vld [vmem:[%s707_s1 + $0x28] sm:$0xff]  ;;  %v562_v10 = vld [vmem:[%s707_s1 + $0x40] sm:$0xff]  ;;  %vm302_vm2 = vcmask 154624   ;;  %v557_v18 = vld [vmem:[%s707_s1 + $0x18] sm:$0xff] }
   0xd   : > { %v317_v5 = vsel %vm315_vm0, 4294967295, %v591_v4  ;;  %s545_s23 = sshll.u32 %s711_s18, 3  ;;  %v558_v14 = vld [vmem:[%s707_s1 + $0x20] sm:$0xff]  ;;  %v556_v19 = vld [vmem:[%s707_s1 + $0x10] sm:$0xff]  ;;  %v555_v20 = vld [vmem:[%s707_s1 + $0x8] sm:$0xff]  ;;  %s470_s15 = sshll.u32 %s711_s18, 2 }
   0xe   : > { %v292_v6 = vpack.c.b16 %v282_v2, %v282_v2  ;;  %v318_v7 = vsel %vm316_vm1, %v317_v5, 0  ;;  %s641_s28 = scalar_lea.vmem %s706_s0, %s545_s23  ;;  %v554_v24 = vld [vmem:[%s707_s1] sm:$0xff]  ;;  %s685_s19 = scalar_lea.vmem %s709_s3, %s470_s15  ;;  %vm396_vm3 = vcmask 519168  }
   0xf   : > { %v548_v11 = vld [vmem:[%s641_s28 + $0x14] sm:$0xf]  ;;  %v483_v12 = vld [vmem:[%s641_s28 + $0x18] sm:$0xf0]  ;;  %v546_v15 = vld [vmem:[%s641_s28 + $0x4] sm:$0xf] }
  0x10   : > { %v320_v8 = vand.u32 %v318_v7, %v292_v6  ;;  %323 = vmatpush.bf16.msra.mxu0 %v560_v3  ;;  %564 = vmatpush.bf16.msra.mxu2 %v560_v3  ;;  %v486_v13 = vor.u32 %v548_v11, %v483_v12  ;;  %v475_v16 = vld [vmem:[%s641_s28 + $0x8] sm:$0xf0]  ;;  %v550_v21 = vld [vmem:[%s641_s28 + $0x24] sm:$0xf]  ;;  %v473_v25 = vld [vmem:[%s641_s28] sm:$0xf] }
  0x11   : > { %v478_v17 = vor.u32 %v546_v15, %v475_v16  ;;  %v491_v22 = vld [vmem:[%s641_s28 + $0x28] sm:$0xf0]  ;;  %v547_v26 = vld [vmem:[%s641_s28 + $0x4] sm:$0xf0]  ;;  %v489_v27 = vld [vmem:[%s641_s28 + $0x20] sm:$0xf] }
  0x12   : > { %571 = vmatpush.bf16.msra.mxu3 %v320_v8  ;;  %357 = vmatpush.bf16.msra.mxu1 %v320_v8  ;;  %v494_v23 = vor.u32 %v550_v21, %v491_v22  ;;  %v551_v28 = vld [vmem:[%s641_s28 + $0x24] sm:$0xf0]  ;;  %v474_v29 = vor.u32 %v547_v26, %v473_v25  ;;  %v552_v31 = vld [vmem:[%s641_s28 + $0x34] sm:$0xf]  ;;  %v499_v32 = vld [vmem:[%s641_s28 + $0x38] sm:$0xf0] }
  0x13   : > { %v490_v30 = vor.u32 %v551_v28, %v489_v27  ;;  %v502_v33 = vor.u32 %v552_v31, %v499_v32  ;;  %v481_v34 = vld [vmem:[%s641_s28 + $0x10] sm:$0xf]  ;;  %v549_v35 = vld [vmem:[%s641_s28 + $0x14] sm:$0xf0]  ;;  %v582_v42 = vld [vmem:[%s708_s2] ss:$0 sm:$0xff] }
  0x14   : > { %324 = vmatpush.bf16.msra.mxu0 %v559_v9  ;;  %565 = vmatpush.bf16.msra.mxu2 %v559_v9  ;;  %v497_v36 = vld [vmem:[%s641_s28 + $0x30] sm:$0xf]  ;;  %v553_v37 = vld [vmem:[%s641_s28 + $0x34] sm:$0xf0]  ;;  %v482_v38 = vor.u32 %v549_v35, %v481_v34 }
  0x15   : > { %v498_v39 = vor.u32 %v553_v37, %v497_v36 }
  0x16   : > { %572 = vmatpush.bf16.msra.mxu3 %v562_v10  ;;  %358 = vmatpush.bf16.msra.mxu1 %v562_v10 }
  0x18   : > { %325 = vmatpush.bf16.msra.mxu0 %v558_v14  ;;  %566 = vmatpush.bf16.msra.mxu2 %v558_v14 }
  0x19   : > { %540 = vmatmul.msk.bf16.vlgmr.msra.gmra.mxu3 %vm302_vm2, %v486_v13  ;;  %539 = vmatmul.msk.bf16.vlgmr.msra.gmra.mxu1 %vm302_vm2, %v478_v17 }
  0x1c   : > { %326 = vmatpush.bf16.msra.mxu0 %v557_v18  ;;  %567 = vmatpush.bf16.msra.mxu2 %v557_v18 }
  0x20   : > { %327 = vmatpush.bf16.msra.mxu0 %v556_v19  ;;  %568 = vmatpush.bf16.msra.mxu2 %v556_v19 }
  0x24   : > { %328 = vmatpush.bf16.msra.mxu0 %v555_v20  ;;  %569 = vmatpush.bf16.msra.mxu2 %v555_v20 }
  0x28   : > { %329 = vmatpush.bf16.msra.mxu0 %v554_v24  ;;  %570 = vmatpush.bf16.msra.mxu2 %v554_v24 }
  0x29   : > { %541 = vmatmul.msk.bf16.gmra.mxu3 %vm302_vm2, %v494_v23 }
  0x2b   : > { %330 = vmatmul.bf16.vlgmr.msra.gmra.mxu0 %v474_v29  ;;  %340 = vmatmul.bf16.vlgmr.msra.gmra.mxu2 %v490_v30 }
  0x39   : > { %542 = vmatmul.msk.bf16.gmra.mxu3 %vm302_vm2, %v502_v33 }
  0x3b   : > { %335 = vmatmul.bf16.gmra.mxu0 %v482_v38  ;;  %345 = vmatmul.bf16.gmra.mxu2 %v498_v39 }
  0x96   : > { %v360_v43 = vpop.f32.mrf.mxu1 }
  0x9c   : > { %v365_v40 = vpop.f32.mrf.mxu3 }
  0x9e   : > { %v362_v53 = vpop.f32.mrf.mxu1 }
  0xa4   : > { %v367_v41 = vpop.f32.mrf.mxu3 }
  0xa8   : > { %v331_v44 = vpop.f32.mrf.mxu0 }
  0xa9   : > { %v332_v45 = vadd.f32 %v582_v42, %v331_v44 }
  0xab   : > { %v361_v46 = vadd.f32 %v360_v43, %v332_v45 }
  0xac   : > { %v370_v47 = vpop.f32.mrf.mxu3 }
  0xad   : > { %v380_v48 = vmax.f32 %v361_v46, 0.0 }
  0xae   : > { %v341_v50 = vpop.f32.mrf.mxu2 }
  0xaf   : > { %v388_v49 = vpack.c.bf16 %v380_v48, %v380_v48  ;;  %v342_v51 = vadd.f32 %v582_v42, %v341_v50 }
  0xb0   : > { %v333_v52 = vpop.f32.mrf.mxu0 }
  0xb1   : > { %397 = vst.msk [vmem:[%s685_s19] sm:$0xf] %vm396_vm3, %v388_v49  ;;  %v334_v54 = vadd.f32 %v582_v42, %v333_v52  ;;  %v371_v55 = vadd.f32 %v370_v47, %v342_v51 }
  0xb3   : > { %v363_v56 = vadd.f32 %v362_v53, %v334_v54  ;;  %v384_v57 = vmax.f32 %v371_v55, 0.0 }
  0xb4   : > { %v372_v59 = vpop.f32.mrf.mxu3 }
  0xb5   : > { %v381_v58 = vmax.f32 %v363_v56, 0.0  ;;  %v392_v60 = vpack.c.bf16 %v384_v57, %v384_v57 }
  0xb6   : > { %v343_v62 = vpop.f32.mrf.mxu2 }
  0xb7   : > { %v389_v61 = vpack.c.bf16 %v381_v58, %v381_v58  ;;  %401 = vst.msk [vmem:[%s685_s19 + $0x10] sm:$0xf] %vm396_vm3, %v392_v60  ;;  %v344_v63 = vadd.f32 %v582_v42, %v343_v62 }
  0xb8   : > { %v336_v0 = vpop.f32.mrf.mxu0 }
  0xb9   : > { %398 = vst.msk [vmem:[%s685_s19 + $0x4] sm:$0xf] %vm396_vm3, %v389_v61  ;;  %v337_v1 = vadd.f32 %v582_v42, %v336_v0  ;;  %v373_v2 = vadd.f32 %v372_v59, %v344_v63 }
  0xbb   : > { %v366_v3 = vadd.f32 %v365_v40, %v337_v1  ;;  %v385_v4 = vmax.f32 %v373_v2, 0.0 }
  0xbc   : > { %v375_v8 = vpop.f32.mrf.mxu3 }
  0xbd   : > { %v382_v5 = vmax.f32 %v366_v3, 0.0  ;;  %v393_v6 = vpack.c.bf16 %v385_v4, %v385_v4 }
  0xbe   : > { %v346_v9 = vpop.f32.mrf.mxu2 }
  0xbf   : > { %v390_v7 = vpack.c.bf16 %v382_v5, %v382_v5  ;;  %402 = vst.msk [vmem:[%s685_s19 + $0x14] sm:$0xf] %vm396_vm3, %v393_v6  ;;  %v347_v10 = vadd.f32 %v582_v42, %v346_v9 }
  0xc0   : > { %v338_v11 = vpop.f32.mrf.mxu0 }
  0xc1   : > { %399 = vst.msk [vmem:[%s685_s19 + $0x8] sm:$0xf] %vm396_vm3, %v390_v7  ;;  %v339_v12 = vadd.f32 %v582_v42, %v338_v11  ;;  %v376_v13 = vadd.f32 %v375_v8, %v347_v10 }
  0xc3   : > { %v368_v14 = vadd.f32 %v367_v41, %v339_v12  ;;  %v386_v15 = vmax.f32 %v376_v13, 0.0 }
  0xc4   : > { %v377_v21 = vpop.f32.mrf.mxu3 }
  0xc5   : > { %v383_v16 = vmax.f32 %v368_v14, 0.0  ;;  %v394_v17 = vpack.c.bf16 %v386_v15, %v386_v15 }
  0xc6   : > { %v348_v19 = vpop.f32.mrf.mxu2 }
  0xc7   : > { %v391_v18 = vpack.c.bf16 %v383_v16, %v383_v16  ;;  %403 = vst.msk [vmem:[%s685_s19 + $0x18] sm:$0xf] %vm396_vm3, %v394_v17  ;;  %v349_v20 = vadd.f32 %v582_v42, %v348_v19 }
  0xc9   : > { %400 = vst.msk [vmem:[%s685_s19 + $0xc] sm:$0xf] %vm396_vm3, %v391_v18  ;;  %v378_v22 = vadd.f32 %v377_v21, %v349_v20 }
  0xcb   : > { %v387_v23 = vmax.f32 %v378_v22, 0.0 }
  0xcd   : > { %v395_v24 = vpack.c.bf16 %v387_v23, %v387_v23 }
  0xcf   : > { %404 = vst.msk [vmem:[%s685_s19 + $0x1c] sm:$0xf] %vm396_vm3, %v395_v24 }
  0xd0 PF: > { %s13_s12 = sadd.s32 1, %s589_s12  }
  0xd1   : > { %p10_p4 = scmp.ge.s32.totalorder %s13_s12, 4  }
  0xd3   :  { %12 = sbr.rel (!%p10_p4) target bundleno = 1 (0x1), region = 62 }

// kernel: resnet_context_forward.13
= control target key start
LH: loop header
LB: loop body
LE: loop exit
PB: predicated region body
PF: predicated region fallthrough
CT: control target
= control target key end

     0   :  { %s485_s6 = smov 0   ;;  %s487_s7 = smov 0   ;;  %s561_s0 = inlined_call_operand.vmem [shape: bf16[9,32,64], index: 0, kind: input, shape index: {}]   ;;  %s562_s1 = inlined_call_operand.vmem [shape: bf16[32,64], index: 1, kind: output, shape index: {}]  }
   0x1   :  { %s489_s8 = smov 0  }
   0x2 LB: > { %s369_s9 = sadd.s32 4294967295, %s473_s8   ;;  %s502_s10 = sadd.s32 1, %s473_s8   ;;  %s473_s8 = sphi %s489_s8, %s565_s8   ;;  %s469_s7 = sphi %s487_s7, %s564_s7   ;;  %s465_s6 = sphi %s485_s6, %s563_s6  }
   0x3   : > { %s15_s11 = ssub.s32 %s473_s8, %s502_s10  ;;  %s18_s12 = sadd.s32 1, %s469_s7 }
   0x4   : > { %p16_p0 = scmp.eq.s32.totalorder %s15_s11, 0  ;;  %p25_p1 = scmp.ne.s32.totalorder %s469_s7, %s465_s6 }
   0x5   : > { %p26_p2 = scmp.eq.s32.totalorder %s473_s8, 0  ;;  %p372_p4 = scmp.ge.s32.totalorder %s473_s8, 2 }
   0x6   : > { %s511_s13 = scalar_select %p16_p0, %s469_s7, %s18_s12  }
   0x7   : > { %p27_p3 = por %p26_p2, %p25_p1  ;;  %77 = sbr.rel (%p372_p4) target bundleno = 25 (0x19), region = 16 }
   0xc   : > { %80 = sbr.rel (!%p27_p3) target bundleno = 25 (0x19), region = 20  ;;  %s82_s14 = sand.u32 (%p27_p3), 1, %s469_s7  }
   0xd   : > { %s380_s15 = sshll.u32 (%p27_p3), %s473_s8, 3  ;;  %s425_s16 = smul.u32 (%p27_p3), 72, %s82_s14 }
   0xe   : > { %s87_s19 = scalar_lea.vmem (%p27_p3), %s561_s0, %s380_s15 }
   0xf   : > { %v104_v0 = vld [vmem:[%s87_s19] sm:$0xff] (%p27_p3)   ;;  %v108_v1 = vld [vmem:[%s87_s19 + $0x10] sm:$0xff] (%p27_p3)   ;;  %s84_s20 = scalar_lea.vmem (%p27_p3), [#allocation2], %s425_s16 }
  0x10   : > { %v112_v2 = vld [vmem:[%s87_s19 + $0x20] sm:$0xff] (%p27_p3)   ;;  %105 = vst [vmem:[%s84_s20] sm:$0xff] (%p27_p3), %v104_v0   ;;  %v116_v3 = vld [vmem:[%s87_s19 + $0x30] sm:$0xff] (%p27_p3)  }
  0x11   : > { %109 = vst [vmem:[%s84_s20 + $0x8] sm:$0xff] %v108_v1   ;;  %v120_v4 = vld [vmem:[%s87_s19 + $0x40] sm:$0xff]   ;;  %v124_v5 = vld [vmem:[%s87_s19 + $0x50] sm:$0xff]  }
  0x12   : > { %113 = vst [vmem:[%s84_s20 + $0x10] sm:$0xff] %v112_v2   ;;  %v128_v6 = vld [vmem:[%s87_s19 + $0x60] sm:$0xff]   ;;  %v132_v7 = vld [vmem:[%s87_s19 + $0x70] sm:$0xff]  }
  0x13   : > { %117 = vst [vmem:[%s84_s20 + $0x18] sm:$0xff] %v116_v3   ;;  %v136_v8 = vld [vmem:[%s87_s19 + $0x80] sm:$0xff]  }
  0x14   : > { %121 = vst [vmem:[%s84_s20 + $0x20] sm:$0xff] %v120_v4  }
  0x15   : > { %125 = vst [vmem:[%s84_s20 + $0x28] sm:$0xff] %v124_v5  }
  0x16   : > { %129 = vst [vmem:[%s84_s20 + $0x30] sm:$0xff] %v128_v6  }
  0x17   : > { %133 = vst [vmem:[%s84_s20 + $0x38] sm:$0xff] %v132_v7  }
  0x18   : > { %137 = vst [vmem:[%s84_s20 + $0x40] sm:$0xff] %v136_v8  }
  0x19 PF: > { %p375_p5 = scmp.ge.s32.totalorder %s473_s8, 1  ;;  %p198_p6 = scmp.lt.s32.totalorder %s473_s8, 3 }
  0x1b   : > { %p199_p7 = pnand %p375_p5, %p198_p6 }
  0x1c   : > { %s205_s21 = sand.u32 (!%p199_p7), 1, %s465_s6   ;;  %s524_s24 = sshll.u32 (!%p199_p7), %s369_s9, 1 }
  0x1d   : > { %202 = sbr.rel (%p199_p7) target bundleno = 56 (0x38), region = 61  ;;  %p226_p8 = scmp.lt.s32.totalorder (!%p199_p7), %s524_s24, 3 }
  0x1e   : > { %s426_s22 = smul.u32 (!%p199_p7), 72, %s205_s21 }
  0x20   : > { %s207_s23 = scalar_lea.vmem (!%p199_p7), [#allocation2], %s426_s22 }
  0x22   : > { %v382_v9 = vld [vmem:[%s207_s23] sm:$0xff]   ;;  %v417_v10 = vld [vmem:[%s207_s23 + $0x8] sm:$0xff]   ;;  %v418_v11 = vld [vmem:[%s207_s23 + $0x10] sm:$0xff]   ;;  %vm267_vm0 = vcmask 523264   ;;  %s567_s24 = smov (!%p226_p8, %s524_s24), 3  ;;  %vm304_vm1 = vcmask 519168  }
  0x23   : > { %v383_v12 = vunpack.c.l.bf16 %v382_v9  ;;  %v384_v13 = vunpack.c.h.bf16 %v382_v9  ;;  %v387_v14 = vunpack.c.l.bf16 %v417_v10  ;;  %v388_v15 = vunpack.c.h.bf16 %v417_v10  ;;  %v419_v16 = vld [vmem:[%s207_s23 + $0x18] sm:$0xff]   ;;  %v420_v17 = vld [vmem:[%s207_s23 + $0x20] sm:$0xff]   ;;  %v421_v18 = vld [vmem:[%s207_s23 + $0x28] sm:$0xff]   ;;  %s377_s25 = sshll.u32 %s567_s24, 2 }
  0x24   : > { %v391_v19 = vunpack.c.l.bf16 %v418_v11  ;;  %v392_v20 = vunpack.c.h.bf16 %v418_v11  ;;  %v395_v21 = vunpack.c.l.bf16 %v419_v16  ;;  %v396_v22 = vunpack.c.h.bf16 %v419_v16  ;;  %v422_v23 = vld [vmem:[%s207_s23 + $0x30] sm:$0xff]   ;;  %v423_v24 = vld [vmem:[%s207_s23 + $0x38] sm:$0xff]   ;;  %v424_v25 = vld [vmem:[%s207_s23 + $0x40] sm:$0xff]   ;;  %s229_s28 = scalar_lea.vmem %s562_s1, %s377_s25 }
  0x25   : > { %v399_v26 = vunpack.c.l.bf16 %v420_v17  ;;  %v400_v27 = vunpack.c.h.bf16 %v420_v17  ;;  %v403_v28 = vunpack.c.l.bf16 %v421_v18  ;;  %v404_v29 = vunpack.c.h.bf16 %v421_v18 }
  0x26   : > { %v407_v30 = vunpack.c.l.bf16 %v422_v23  ;;  %v408_v31 = vunpack.c.h.bf16 %v422_v23  ;;  %v411_v32 = vunpack.c.l.bf16 %v423_v24  ;;  %v412_v33 = vunpack.c.h.bf16 %v423_v24 }
  0x27   : > { %v415_v34 = vunpack.c.l.bf16 %v424_v25  ;;  %v416_v35 = vunpack.c.h.bf16 %v424_v25  ;;  %v268_v36 = vsel %vm267_vm0, %v383_v12, -inf  ;;  %v269_v37 = vsel %vm267_vm0, %v387_v14, -inf }
  0x28   : > { %v270_v38 = vsel %vm267_vm0, %v391_v19, -inf  ;;  %v272_v39 = vsel %vm267_vm0, %v395_v21, -inf  ;;  %v274_v40 = vsel %vm267_vm0, %v399_v26, -inf  ;;  %v276_v41 = vsel %vm267_vm0, %v403_v28, -inf }
  0x29   : > { %v271_v42 = vmax.f32 %v268_v36, %v270_v38  ;;  %v273_v43 = vmax.f32 %v269_v37, %v272_v39  ;;  %v278_v44 = vsel %vm267_vm0, %v407_v30, -inf  ;;  %v280_v45 = vsel %vm267_vm0, %v411_v32, -inf }
  0x2a   : > { %v282_v46 = vsel %vm267_vm0, %v415_v34, -inf  ;;  %v285_v47 = vsel %vm267_vm0, %v384_v13, -inf  ;;  %v286_v48 = vsel %vm267_vm0, %v388_v15, -inf  ;;  %v287_v49 = vsel %vm267_vm0, %v392_v20, -inf }
  0x2b   : > { %v275_v50 = vmax.f32 %v271_v42, %v274_v40  ;;  %v277_v51 = vmax.f32 %v273_v43, %v276_v41  ;;  %v288_v52 = vmax.f32 %v285_v47, %v287_v49  ;;  %v289_v53 = vsel %vm267_vm0, %v396_v22, -inf }
  0x2c   : > { %v290_v54 = vmax.f32 %v286_v48, %v289_v53  ;;  %v291_v55 = vsel %vm267_vm0, %v400_v27, -inf  ;;  %v293_v56 = vsel %vm267_vm0, %v404_v29, -inf  ;;  %v295_v57 = vsel %vm267_vm0, %v408_v31, -inf }
  0x2d   : > { %v279_v58 = vmax.f32 %v275_v50, %v278_v44  ;;  %v281_v59 = vmax.f32 %v277_v51, %v280_v45  ;;  %v292_v60 = vmax.f32 %v288_v52, %v291_v55  ;;  %v297_v61 = vsel %vm267_vm0, %v412_v33, -inf }
  0x2e   : > { %v294_v62 = vmax.f32 %v290_v54, %v293_v56  ;;  %v299_v63 = vsel %vm267_vm0, %v416_v35, -inf }
  0x2f   : > { %v283_v0 = vmax.f32 %v279_v58, %v282_v46  ;;  %v296_v1 = vmax.f32 %v292_v60, %v295_v57 }
  0x30   : > { %v298_v2 = vmax.f32 %v294_v62, %v297_v61 }
  0x31   : > { %v284_v3 = vmax.f32 %v283_v0, %v281_v59  ;;  %v300_v4 = vmax.f32 %v296_v1, %v299_v63 }
  0x33   : > { %v302_v5 = vpack.c.bf16 %v284_v3, %v284_v3  ;;  %v301_v6 = vmax.f32 %v300_v4, %v298_v2 }
  0x35   : > { %305 = vst.msk [vmem:[%s229_s28] sm:$0xf] %vm304_vm1, %v302_v5  ;;  %v303_v7 = vpack.c.bf16 %v301_v6, %v301_v6 }
  0x37   : > { %306 = vst.msk [vmem:[%s229_s28 + $0x4] sm:$0xf] %vm304_vm1, %v303_v7 }
  0x38 PF: > { %p8_p9 = scmp.ge.s32.totalorder %s502_s10, 4   ;;  %s563_s6 = smov %s469_s7 }
  0x39   : > { %s564_s7 = smov %s511_s13  ;;  %s565_s8 = smov %s502_s10 }
  0x3a   :  { %10 = sbr.rel (!%p8_p9) target bundleno = 2 (0x2), region = 100 }

// kernel: resnet_context_forward.14
= control target key start
LH: loop header
LB: loop body
LE: loop exit
PB: predicated region body
PF: predicated region fallthrough
CT: control target
= control target key end

     0   :  { %s653_s21 = smov 0   ;;  %s745_s0 = inlined_call_operand.vmem [shape: bf16[32,64], index: 0, kind: input, shape index: {}]   ;;  %s746_s1 = inlined_call_operand.vmem [shape: bf16[64,64], index: 1, kind: input, shape index: {}]   ;;  %s747_s2 = inlined_call_operand.vmem [shape: f32[1,64], index: 2, kind: input, shape index: {}]   ;;  %s748_s3 = inlined_call_operand.vmem [shape: bf16[64,256], index: 3, kind: input, shape index: {}]   ;;  %s749_s4 = inlined_call_operand.vmem [shape: f32[1,256], index: 4, kind: input, shape index: {}]   ;;  %s750_s5 = inlined_call_operand.vmem [shape: bf16[32,64], index: 5, kind: output, shape index: {0}]   ;;  %s751_s6 = inlined_call_operand.vmem [shape: bf16[32,256], index: 6, kind: output, shape index: {1}]  }
   0x1 LB: > { %s518_s22 = sadd.s32 4294967295, %s616_s21   ;;  %p522_p0 = scmp.ge.s32.totalorder %s616_s21, 1  ;;  %s616_s21 = sphi %s653_s21, %s17_s21  }
   0x2   : > { %p216_p1 = scmp.lt.s32.totalorder %s616_s21, 3 }
   0x4   : > { %p217_p2 = pnand %p522_p0, %p216_p1 }
   0x5   : > { %s523_s29 = sshll.u32 (!%p217_p2), %s518_s22, 1 }
   0x6   : > { %220 = sbr.rel (%p217_p2) target bundleno = 175 (0xaf), region = 40  ;;  %p253_p3 = scmp.lt.s32.totalorder (!%p217_p2), %s523_s29, 3 }
   0xb   : > { %v592_v0 = vld [vmem:[%s746_s1 + $0x18] sm:$0xff]  ;;  %v577_v1 = vld [vmem:[%s748_s3 + $0x30] sm:$0xf]  ;;  %v599_v4 = vld [vmem:[%s748_s3 + $0x34] sm:$0xf]  ;;  %s753_s29 = smov (!%p253_p3, %s523_s29), 3 }
   0xc   : > { %v600_v2 = vld [vmem:[%s748_s3 + $0x34] sm:$0xf0]  ;;  %v579_v5 = vld [vmem:[%s748_s3 + $0x38] sm:$0xf0]  ;;  %v591_v6 = vld [vmem:[%s746_s1 + $0x10] sm:$0xff]  ;;  %323 = vmatpush.bf16.msra.mxu0 %v592_v0  ;;  %s524_s8 = sshll.u32 %s753_s29, 2 }
   0xd   : > { %v578_v3 = vor.u32 %v600_v2, %v577_v1  ;;  %v582_v7 = vor.u32 %v599_v4, %v579_v5  ;;  %v569_v8 = vld [vmem:[%s748_s3 + $0x20] sm:$0xf]  ;;  %v598_v9 = vld [vmem:[%s748_s3 + $0x24] sm:$0xf0]  ;;  %v597_v10 = vld [vmem:[%s748_s3 + $0x24] sm:$0xf]  ;;  %s256_s22 = scalar_lea.vmem %s745_s0, %s524_s8  ;;  %s262_s30 = scalar_lea.vmem %s750_s5, %s524_s8 }
   0xe   : > { %v570_v11 = vor.u32 %v598_v9, %v569_v8  ;;  %v571_v12 = vld [vmem:[%s748_s3 + $0x28] sm:$0xf0]  ;;  %v561_v14 = vld [vmem:[%s748_s3 + $0x10] sm:$0xf]  ;;  %v596_v15 = vld [vmem:[%s748_s3 + $0x14] sm:$0xf0] }
   0xf   : > { %398 = vmatpush.bf16.msra.mxu1 %v578_v3  ;;  %412 = vmatpush.bf16.msra.mxu2 %v582_v7  ;;  %v574_v13 = vor.u32 %v597_v10, %v571_v12  ;;  %v595_v16 = vld [vmem:[%s748_s3 + $0x14] sm:$0xf]  ;;  %v563_v17 = vld [vmem:[%s748_s3 + $0x18] sm:$0xf0]  ;;  %v590_v18 = vld [vmem:[%s746_s1 + $0x8] sm:$0xff]  ;;  %v562_v19 = vor.u32 %v596_v15, %v561_v14  ;;  %vm315_vm0 = vcmask 523264  }
  0x10   : > { %324 = vmatpush.bf16.msra.mxu0 %v591_v6  ;;  %v566_v20 = vor.u32 %v595_v16, %v563_v17  ;;  %v553_v21 = vld [vmem:[%s748_s3] sm:$0xf]  ;;  %v594_v22 = vld [vmem:[%s748_s3 + $0x4] sm:$0xf0]  ;;  %v593_v23 = vld [vmem:[%s748_s3 + $0x4] sm:$0xf] }
  0x11   : > { %v555_v24 = vld [vmem:[%s748_s3 + $0x8] sm:$0xf0]  ;;  %v589_v25 = vld [vmem:[%s746_s1] sm:$0xff]  ;;  %v554_v26 = vor.u32 %v594_v22, %v553_v21  ;;  %vm337_vm1 = vcmask 519168   ;;  %s587_s7 = sshll.u32 %s753_s29, 3 }
  0x12   : > { %v558_v27 = vor.u32 %v593_v23, %v555_v24  ;;  %v588_v28 = vld [vmem:[%s256_s22] sm:$0xff]  ;;  %s269_s11 = scalar_lea.vmem %s751_s6, %s587_s7 }
  0x13   : > { %399 = vmatpush.bf16.msra.mxu1 %v570_v11  ;;  %413 = vmatpush.bf16.msra.mxu2 %v574_v13  ;;  %v609_v29 = vld [vmem:[%s747_s2] ss:$0 sm:$0xff] }
  0x14   : > { %325 = vmatpush.bf16.msra.mxu0 %v590_v18  ;;  %v348_v31 = vld [vmem:[%s749_s4] sm:$0x3] }
  0x15   : > { %v350_v34 = vperm.slane %v348_v31, 0  ;;  %v351_v37 = vperm.slane %v348_v31, 1 }
  0x17   : > { %400 = vmatpush.bf16.msra.mxu1 %v562_v19  ;;  %414 = vmatpush.bf16.msra.mxu2 %v566_v20 }
  0x18   : > { %326 = vmatpush.bf16.msra.mxu0 %v589_v25 }
  0x1b   : > { %401 = vmatpush.bf16.msra.mxu1 %v554_v26  ;;  %415 = vmatpush.bf16.msra.mxu2 %v558_v27 }
  0x1c   : > { %550 = vmatmul.msk.bf16.vlgmr.msra.gmra.mxu0 %vm315_vm0, %v588_v28 }
  0x1e   : > { %583 = vmatmul.msk.bf16.vlgmr.msra.gmra.mxu1 %vm315_vm0, %v588_v28  ;;  %584 = vmatmul.msk.bf16.vlgmr.msra.gmra.mxu2 %vm315_vm0, %v588_v28 }
  0x99   : > { %v328_v30 = vpop.f32.mrf.mxu0 }
  0x9a   : > { %v329_v32 = vadd.f32 %v609_v29, %v328_v30 }
  0x9b   : > { %v403_v35 = vpop.f32.mrf.mxu1 }
  0x9c   : > { %v333_v33 = vmax.f32 %v329_v32, 0.0  ;;  %v404_v38 = vadd.f32 %v403_v35, %v350_v34 }
  0x9e   : > { %v335_v36 = vpack.c.bf16 %v333_v33, %v333_v33 }
  0xa0   : > { %338 = vst.msk [vmem:[%s262_s30] sm:$0xf] %vm337_vm1, %v335_v36 }
  0xa1   : > { %v417_v39 = vpop.f32.mrf.mxu2  ;;  %v330_v40 = vpop.f32.mrf.mxu0 }
  0xa2   : > { %v418_v41 = vadd.f32 %v417_v39, %v351_v37  ;;  %v331_v42 = vadd.f32 %v609_v29, %v330_v40 }
  0xa3   : > { %v405_v46 = vpop.f32.mrf.mxu1 }
  0xa4   : > { %v422_v43 = vpack.c.bf16 %v418_v41, %v404_v38  ;;  %v334_v44 = vmax.f32 %v331_v42, 0.0  ;;  %v406_v48 = vadd.f32 %v405_v46, %v350_v34 }
  0xa6   : > { %424 = vst [vmem:[%s269_s11] sm:$0xff] %v422_v43  ;;  %v336_v45 = vpack.c.bf16 %v334_v44, %v334_v44 }
  0xa8   : > { %339 = vst.msk [vmem:[%s262_s30 + $0x4] sm:$0xf] %vm337_vm1, %v336_v45 }
  0xa9   : > { %v419_v47 = vpop.f32.mrf.mxu2 }
  0xaa   : > { %v420_v49 = vadd.f32 %v419_v47, %v351_v37 }
  0xac   : > { %v423_v50 = vpack.c.bf16 %v420_v49, %v406_v48 }
  0xae   : > { %425 = vst [vmem:[%s269_s11 + $0x8] sm:$0xff] %v423_v50 }
  0xaf PF: > { %s17_s21 = sadd.s32 1, %s616_s21  }
  0xb0   : > { %p14_p4 = scmp.ge.s32.totalorder %s17_s21, 4  }
  0xb2   :  { %16 = sbr.rel (!%p14_p4) target bundleno = 1 (0x1), region = 82 }

// kernel: resnet_context_forward.16
= control target key start
LH: loop header
LB: loop body
LE: loop exit
PB: predicated region body
PF: predicated region fallthrough
CT: control target
= control target key end

     0   :  { %s515_s15 = smov 0   ;;  %s590_s0 = inlined_call_operand.vmem [shape: bf16[32,64], index: 0, kind: input, shape index: {}]   ;;  %s591_s1 = inlined_call_operand.vmem [shape: bf16[64,256], index: 1, kind: input, shape index: {}]   ;;  %s592_s2 = inlined_call_operand.vmem [shape: f32[1,256], index: 2, kind: input, shape index: {}]   ;;  %s593_s3 = inlined_call_operand.vmem [shape: bf16[32,256], index: 3, kind: input, shape index: {}]   ;;  %s594_s4 = inlined_call_operand.vmem [shape: bf16[32,256], index: 4, kind: output, shape index: {}]  }
   0x1 LB: > { %s410_s16 = sadd.s32 4294967295, %s488_s15   ;;  %p414_p0 = scmp.ge.s32.totalorder %s488_s15, 1  ;;  %s488_s15 = sphi %s515_s15, %s14_s15  }
   0x2   : > { %p175_p1 = scmp.lt.s32.totalorder %s488_s15, 3 }
   0x4   : > { %p176_p2 = pnand %p414_p0, %p175_p1 }
   0x5   : > { %s415_s17 = sshll.u32 (!%p176_p2), %s410_s16, 1 }
   0x6   : > { %179 = sbr.rel (%p176_p2) target bundleno = 173 (0xad), region = 36  ;;  %p209_p3 = scmp.lt.s32.totalorder (!%p176_p2), %s415_s17, 3 }
   0xb   : > { %v453_v0 = vld [vmem:[%s591_s1 + $0x30] sm:$0xf]  ;;  %v473_v1 = vld [vmem:[%s591_s1 + $0x34] sm:$0xf0]  ;;  %v472_v2 = vld [vmem:[%s591_s1 + $0x34] sm:$0xf] }
   0xc   : > { %v454_v3 = vor.u32 %v473_v1, %v453_v0  ;;  %v455_v4 = vld [vmem:[%s591_s1 + $0x38] sm:$0xf0]  ;;  %v445_v5 = vld [vmem:[%s591_s1 + $0x20] sm:$0xf]  ;;  %v471_v6 = vld [vmem:[%s591_s1 + $0x24] sm:$0xf0] }
   0xd   : > { %v458_v7 = vor.u32 %v472_v2, %v455_v4  ;;  %v470_v8 = vld [vmem:[%s591_s1 + $0x24] sm:$0xf]  ;;  %v447_v9 = vld [vmem:[%s591_s1 + $0x28] sm:$0xf0]  ;;  %v446_v10 = vor.u32 %v471_v6, %v445_v5  ;;  %v437_v12 = vld [vmem:[%s591_s1 + $0x10] sm:$0xf] }
   0xe   : > { %298 = vmatpush.bf16.msra.mxu0 %v454_v3  ;;  %v450_v11 = vor.u32 %v470_v8, %v447_v9  ;;  %v469_v13 = vld [vmem:[%s591_s1 + $0x14] sm:$0xf0]  ;;  %v468_v14 = vld [vmem:[%s591_s1 + $0x14] sm:$0xf]  ;;  %v439_v15 = vld [vmem:[%s591_s1 + $0x18] sm:$0xf0] }
   0xf   : > { %312 = vmatpush.bf16.msra.mxu1 %v458_v7  ;;  %v438_v16 = vor.u32 %v469_v13, %v437_v12  ;;  %v442_v17 = vor.u32 %v468_v14, %v439_v15  ;;  %v429_v18 = vld [vmem:[%s591_s1] sm:$0xf]  ;;  %v467_v19 = vld [vmem:[%s591_s1 + $0x4] sm:$0xf0]  ;;  %s596_s17 = smov (!%p209_p3, %s415_s17), 3  ;;  %vm290_vm0 = vcmask 523264  }
  0x10   : > { %v466_v20 = vld [vmem:[%s591_s1 + $0x4] sm:$0xf]  ;;  %v431_v21 = vld [vmem:[%s591_s1 + $0x8] sm:$0xf0]  ;;  %s416_s25 = sshll.u32 %s596_s17, 2  ;;  %v430_v22 = vor.u32 %v467_v19, %v429_v18  ;;  %s463_s29 = sshll.u32 %s596_s17, 3 }
  0x11   : > { %s212_s28 = scalar_lea.vmem %s590_s0, %s416_s25  ;;  %v434_v23 = vor.u32 %v466_v20, %v431_v21  ;;  %s219_s6 = scalar_lea.vmem %s593_s3, %s463_s29  ;;  %v239_v25 = vld [vmem:[%s592_s2] sm:$0x3] }
  0x12   : > { %299 = vmatpush.bf16.msra.mxu0 %v446_v10  ;;  %v465_v24 = vld [vmem:[%s212_s28] sm:$0xff]  ;;  %v241_v27 = vperm.slane %v239_v25, 0  ;;  %v242_v28 = vperm.slane %v239_v25, 1  ;;  %v323_v37 = vld [vmem:[%s219_s6 + $0x8] sm:$0xff]  ;;  %s226_s11 = scalar_lea.vmem %s594_s4, %s463_s29 }
  0x13   : > { %313 = vmatpush.bf16.msra.mxu1 %v450_v11  ;;  %v322_v26 = vld [vmem:[%s219_s6] sm:$0xff]  ;;  %v326_v40 = vunpack.c.l.bf16 %v323_v37  ;;  %v327_v43 = vunpack.c.h.bf16 %v323_v37 }
  0x14   : > { %v324_v29 = vunpack.c.l.bf16 %v322_v26  ;;  %v325_v31 = vunpack.c.h.bf16 %v322_v26 }
  0x16   : > { %300 = vmatpush.bf16.msra.mxu0 %v438_v16 }
  0x17   : > { %314 = vmatpush.bf16.msra.mxu1 %v442_v17 }
  0x1a   : > { %301 = vmatpush.bf16.msra.mxu0 %v430_v22 }
  0x1b   : > { %315 = vmatpush.bf16.msra.mxu1 %v434_v23 }
  0x1d   : > { %459 = vmatmul.msk.bf16.vlgmr.msra.gmra.mxu0 %vm290_vm0, %v465_v24 }
  0x1e   : > { %460 = vmatmul.msk.bf16.vlgmr.msra.gmra.mxu1 %vm290_vm0, %v465_v24 }
  0x9a   : > { %v303_v30 = vpop.f32.mrf.mxu0 }
  0x9b   : > { %v304_v32 = vadd.f32 %v303_v30, %v241_v27  ;;  %v317_v33 = vpop.f32.mrf.mxu1 }
  0x9c   : > { %v318_v34 = vadd.f32 %v317_v33, %v242_v28 }
  0x9d   : > { %v328_v35 = vadd.f32 %v324_v29, %v304_v32 }
  0x9e   : > { %v329_v36 = vadd.f32 %v325_v31, %v318_v34 }
  0x9f   : > { %v332_v38 = vmax.f32 %v328_v35, 0.0 }
  0xa0   : > { %v333_v39 = vmax.f32 %v329_v36, 0.0 }
  0xa2   : > { %v336_v41 = vpack.c.bf16 %v333_v39, %v332_v38  ;;  %v305_v42 = vpop.f32.mrf.mxu0 }
  0xa3   : > { %v306_v44 = vadd.f32 %v305_v42, %v241_v27  ;;  %v319_v45 = vpop.f32.mrf.mxu1 }
  0xa4   : > { %338 = vst [vmem:[%s226_s11] sm:$0xff] %v336_v41  ;;  %v320_v46 = vadd.f32 %v319_v45, %v242_v28 }
  0xa5   : > { %v330_v47 = vadd.f32 %v326_v40, %v306_v44 }
  0xa6   : > { %v331_v48 = vadd.f32 %v327_v43, %v320_v46 }
  0xa7   : > { %v334_v49 = vmax.f32 %v330_v47, 0.0 }
  0xa8   : > { %v335_v50 = vmax.f32 %v331_v48, 0.0 }
  0xaa   : > { %v337_v51 = vpack.c.bf16 %v335_v50, %v334_v49 }
  0xac   : > { %339 = vst [vmem:[%s226_s11 + $0x8] sm:$0xff] %v337_v51 }
  0xad PF: > { %s14_s15 = sadd.s32 1, %s488_s15  }
  0xae   : > { %p11_p4 = scmp.ge.s32.totalorder %s14_s15, 4  }
  0xb0   :  { %13 = sbr.rel (!%p11_p4) target bundleno = 1 (0x1), region = 69 }

// kernel: resnet_context_forward.17
= control target key start
LH: loop header
LB: loop body
LE: loop exit
PB: predicated region body
PF: predicated region fallthrough
CT: control target
= control target key end

     0   :  { %s552_s12 = smov 0   ;;  %s624_s0 = inlined_call_operand.vmem [shape: bf16[32,256], index: 0, kind: input, shape index: {}]   ;;  %s625_s1 = inlined_call_operand.vmem [shape: bf16[256,64], index: 1, kind: input, shape index: {}]   ;;  %s626_s2 = inlined_call_operand.vmem [shape: f32[1,64], index: 2, kind: input, shape index: {}]   ;;  %s627_s3 = inlined_call_operand.vmem [shape: bf16[32,64], index: 3, kind: output, shape index: {}]  }
   0x1 LB: > { %s412_s13 = sadd.s32 4294967295, %s530_s12   ;;  %p416_p0 = scmp.ge.s32.totalorder %s530_s12, 1  ;;  %s530_s12 = sphi %s552_s12, %s13_s12  }
   0x2   : > { %p139_p1 = scmp.lt.s32.totalorder %s530_s12, 3 }
   0x4   : > { %p140_p2 = pnand %p416_p0, %p139_p1 }
   0x5   : > { %s417_s26 = sshll.u32 (!%p140_p2), %s412_s13, 1 }
   0x6   : > { %143 = sbr.rel (%p140_p2) target bundleno = 186 (0xba), region = 32  ;;  %p165_p3 = scmp.lt.s32.totalorder (!%p140_p2), %s417_s26, 3 }
   0xb   : > { %v506_v0 = vld [vmem:[%s625_s1 + $0x38] sm:$0xff]  ;;  %v505_v2 = vld [vmem:[%s625_s1 + $0x30] sm:$0xff]  ;;  %v504_v4 = vld [vmem:[%s625_s1 + $0x28] sm:$0xff]  ;;  %s629_s26 = smov (!%p165_p3, %s417_s26), 3  ;;  %vm353_vm0 = vcmask 519168  }
   0xc   : > { %v514_v1 = vld [vmem:[%s625_s1 + $0x78] sm:$0xff]  ;;  %321 = vmatpush.bf16.msra.mxu0 %v506_v0  ;;  %v513_v3 = vld [vmem:[%s625_s1 + $0x70] sm:$0xff]  ;;  %v512_v5 = vld [vmem:[%s625_s1 + $0x68] sm:$0xff]  ;;  %s496_s13 = sshll.u32 %s629_s26, 3  ;;  %s421_s28 = sshll.u32 %s629_s26, 2 }
   0xd   : > { %335 = vmatpush.bf16.msra.mxu1 %v514_v1  ;;  %v503_v6 = vld [vmem:[%s625_s1 + $0x20] sm:$0xff]  ;;  %v502_v8 = vld [vmem:[%s625_s1 + $0x18] sm:$0xff]  ;;  %v501_v10 = vld [vmem:[%s625_s1 + $0x10] sm:$0xff]  ;;  %s169_s20 = scalar_lea.vmem %s624_s0, %s496_s13  ;;  %s175_s4 = scalar_lea.vmem %s627_s3, %s421_s28 }
   0xe   : > { %v511_v7 = vld [vmem:[%s625_s1 + $0x60] sm:$0xff]  ;;  %v510_v9 = vld [vmem:[%s625_s1 + $0x58] sm:$0xff]  ;;  %v509_v11 = vld [vmem:[%s625_s1 + $0x50] sm:$0xff] }
   0xf   : > { %v500_v12 = vld [vmem:[%s625_s1 + $0x8] sm:$0xff]  ;;  %v499_v14 = vld [vmem:[%s625_s1] sm:$0xff] }
  0x10   : > { %322 = vmatpush.bf16.msra.mxu0 %v505_v2  ;;  %v508_v13 = vld [vmem:[%s625_s1 + $0x48] sm:$0xff]  ;;  %v507_v15 = vld [vmem:[%s625_s1 + $0x40] sm:$0xff] }
  0x11   : > { %336 = vmatpush.bf16.msra.mxu1 %v513_v3  ;;  %v424_v16 = vld [vmem:[%s169_s20] sm:$0xf]  ;;  %v498_v17 = vld [vmem:[%s169_s20 + $0x4] sm:$0xf0]  ;;  %v497_v18 = vld [vmem:[%s169_s20 + $0x4] sm:$0xf] }
  0x12   : > { %v426_v19 = vld [vmem:[%s169_s20 + $0x8] sm:$0xf0]  ;;  %v425_v20 = vor.u32 %v498_v17, %v424_v16  ;;  %v523_v22 = vld [vmem:[%s626_s2] ss:$0 sm:$0xff] }
  0x13   : > { %v429_v21 = vor.u32 %v497_v18, %v426_v19 }
  0x14   : > { %323 = vmatpush.bf16.msra.mxu0 %v504_v4 }
  0x15   : > { %337 = vmatpush.bf16.msra.mxu1 %v512_v5 }
  0x18   : > { %324 = vmatpush.bf16.msra.mxu0 %v503_v6 }
  0x19   : > { %338 = vmatpush.bf16.msra.mxu1 %v511_v7 }
  0x1c   : > { %325 = vmatpush.bf16.msra.mxu0 %v502_v8 }
  0x1d   : > { %339 = vmatpush.bf16.msra.mxu1 %v510_v9 }
  0x20   : > { %326 = vmatpush.bf16.msra.mxu0 %v501_v10 }
  0x21   : > { %340 = vmatpush.bf16.msra.mxu1 %v509_v11 }
  0x24   : > { %327 = vmatpush.bf16.msra.mxu0 %v500_v12 }
  0x25   : > { %341 = vmatpush.bf16.msra.mxu1 %v508_v13 }
  0x28   : > { %328 = vmatpush.bf16.msra.mxu0 %v499_v14 }
  0x29   : > { %342 = vmatpush.bf16.msra.mxu1 %v507_v15 }
  0x2b   : > { %329 = vmatmul.bf16.vlgmr.msra.gmra.mxu0 %v425_v20 }
  0x2c   : > { %343 = vmatmul.bf16.vlgmr.msra.gmra.mxu1 %v429_v21 }
  0xa8   : > { %v330_v23 = vpop.f32.mrf.mxu0 }
  0xa9   : > { %v344_v24 = vpop.f32.mrf.mxu1  ;;  %v331_v25 = vadd.f32 %v523_v22, %v330_v23 }
  0xab   : > { %v345_v26 = vadd.f32 %v344_v24, %v331_v25 }
  0xad   : > { %v349_v27 = vmax.f32 %v345_v26, 0.0 }
  0xaf   : > { %v351_v28 = vpack.c.bf16 %v349_v27, %v349_v27 }
  0xb0   : > { %v332_v29 = vpop.f32.mrf.mxu0 }
  0xb1   : > { %354 = vst.msk [vmem:[%s175_s4] sm:$0xf] %vm353_vm0, %v351_v28  ;;  %v333_v30 = vadd.f32 %v523_v22, %v332_v29  ;;  %v346_v31 = vpop.f32.mrf.mxu1 }
  0xb3   : > { %v347_v32 = vadd.f32 %v346_v31, %v333_v30 }
  0xb5   : > { %v350_v33 = vmax.f32 %v347_v32, 0.0 }
  0xb7   : > { %v352_v34 = vpack.c.bf16 %v350_v33, %v350_v33 }
  0xb9   : > { %355 = vst.msk [vmem:[%s175_s4 + $0x4] sm:$0xf] %vm353_vm0, %v352_v34 }
  0xba PF: > { %s13_s12 = sadd.s32 1, %s530_s12  }
  0xbb   : > { %p10_p4 = scmp.ge.s32.totalorder %s13_s12, 4  }
  0xbd   :  { %12 = sbr.rel (!%p10_p4) target bundleno = 1 (0x1), region = 62 }

// kernel: resnet_context_forward.15
= control target key start
LH: loop header
LB: loop body
LE: loop exit
PB: predicated region body
PF: predicated region fallthrough
CT: control target
= control target key end

     0   :  { %s1313_s12 = smov 0   ;;  %s1714_s0 = inlined_call_operand.vmem [shape: bf16[2,26,64], index: 0, kind: input, shape index: {}]   ;;  %s1715_s1 = inlined_call_operand.vmem [shape: bf16[9,64,64], index: 1, kind: input, shape index: {}]   ;;  %s1716_s2 = inlined_call_operand.vmem [shape: f32[1,64], index: 2, kind: input, shape index: {}]   ;;  %s1717_s3 = inlined_call_operand.vmem [shape: bf16[2,16,64], index: 3, kind: output, shape index: {}]  }
   0x1 LB: > { %s1003_s13 = sadd.s32 4294967295, %s1290_s12   ;;  %p1007_p0 = scmp.ge.s32.totalorder %s1290_s12, 1  ;;  %s1290_s12 = sphi %s1313_s12, %s13_s12  }
   0x2   : > { %p137_p1 = scmp.lt.s32.totalorder %s1290_s12, 3 }
   0x4   : > { %p138_p2 = pnand %p1007_p0, %p137_p1 }
   0x5   : > { %p161_p3 = scmp.lt.s32.totalorder (!%p138_p2), %s1003_s13, 1 }
   0x6   : > { %141 = sbr.rel (%p138_p2) target bundleno = 215 (0xd7), region = 32 }
   0xb   : > { %v1244_v0 = vld [vmem:[%s1715_s1 + $0x38] sm:$0xff]  ;;  %v174_v2 = vlaneseq  ;;  %v1243_v3 = vld [vmem:[%s1715_s1 + $0x30] sm:$0xff]  ;;  %s1757_s13 = smov (!%p161_p3, %s1003_s13), 1  ;;  %v1242_v12 = vld [vmem:[%s1715_s1 + $0x28] sm:$0xff]  ;;  %vm363_vm0 = vcmask 1040384   ;;  %vm282_vm2 = vcmask 523264  }
   0xc   : > { %v1240_v1 = vld [vmem:[%s1715_s1 + $0x18] sm:$0xff]  ;;  %290 = vmatpush.bf16.msra.mxu0 %v1244_v0  ;;  %v1239_v4 = vld [vmem:[%s1715_s1 + $0x10] sm:$0xff]  ;;  %s1235_s26 = sshll.u32 %s1757_s13, 4  ;;  %v1238_v13 = vld [vmem:[%s1715_s1 + $0x8] sm:$0xff]  ;;  %vm1718_vm1 = vsmask.f32 7424 }
   0xd   : > { %336 = vmatpush.bf16.msra.mxu1 %v1240_v1  ;;  %v1248_v5 = vld [vmem:[%s1715_s1 + $0x58] sm:$0xff]  ;;  %v175_v7 = vshrl.u32 %v174_v2, 7  ;;  %v1247_v10 = vld [vmem:[%s1715_s1 + $0x50] sm:$0xff]  ;;  %s1357_s10 = scalar_lea.vmem %s1714_s0, %s1235_s26  ;;  %v1292_v23 = vmov 0   ;;  %v1246_v25 = vld [vmem:[%s1715_s1 + $0x48] sm:$0xff]  ;;  %vm364_vm3 = vcmask 1044484  }
   0xe   : > { %v1252_v6 = vld [vmem:[%s1715_s1 + $0x78] sm:$0xff]  ;;  %447 = vmatpush.bf16.msra.mxu2 %v1248_v5  ;;  %v1251_v11 = vld [vmem:[%s1715_s1 + $0x70] sm:$0xff]  ;;  %v201_v14 = vld [vmem:[%s1357_s10] sm:$0xf]  ;;  %v1368_v24 = vunpack.c.l.b16 %v1292_v23  ;;  %vm463_vm6 = vcmask 1041408   ;;  %vm464_vm7 = vcmask 1045508   ;;  %v1444_v0 = vunpack.c.h.b16 %v1292_v23 }
   0xf   : > { %547 = vmatpush.bf16.msra.mxu3 %v1252_v6  ;;  %v176_v8 = vadd.s32 8, %v175_v7  ;;  %v181_v9 = vand.u32 3, %v175_v7  ;;  %v1361_v15 = vld [vmem:[%s1357_s10 + $0x4] sm:$0xf]  ;;  %v1364_v16 = vld [vmem:[%s1357_s10 + $0x8] sm:$0x1]  ;;  %v240_v17 = vunpack.c.l.b16 %v201_v14  ;;  %vm1437_vm14 = vmor %vm463_vm6, %vm464_vm7 }
  0x10   : > { %291 = vmatpush.bf16.msra.mxu0 %v1243_v3  ;;  %v241_v18 = vunpack.c.l.b16 %v1361_v15  ;;  %v242_v19 = vunpack.c.l.b16 %v1364_v16  ;;  %v1250_v26 = vld [vmem:[%s1715_s1 + $0x68] sm:$0xff]  ;;  %v1241_v27 = vld [vmem:[%s1715_s1 + $0x20] sm:$0xff]  ;;  %v1256_v33 = vld [vmem:[%s1715_s1 + $0x98] sm:$0xff]  ;;  %vm412_vm7 = vcmask 1046528   ;;  %s1236_s18 = sshll.u32 %s1757_s13, 3 }
  0x11   : > { %337 = vmatpush.bf16.msra.mxu1 %v1239_v4  ;;  %v188_v20 = vand.u32 3, %v176_v8  ;;  %v203_v21 = vadd.s32 4294967295, %v181_v9  ;;  %v347_v22 = vadd.s32 1, %v181_v9  ;;  %v1237_v28 = vld [vmem:[%s1715_s1] sm:$0xff]  ;;  %v1260_v34 = vld [vmem:[%s1715_s1 + $0xb8] sm:$0xff]  ;;  %v1255_v60 = vld [vmem:[%s1715_s1 + $0x90] sm:$0xff]  ;;  %s170_s21 = scalar_lea.vmem %s1717_s3, %s1236_s18 }
  0x12   : > { %448 = vmatpush.bf16.msra.mxu2 %v1247_v10  ;;  %v243_v29 = vpack.c.b16 %v241_v18, %v240_v17  ;;  %v244_v30 = vpack.c.b16 %v242_v19, %v242_v19  ;;  %v1395_v39 = vld [vmem:[%s1357_s10] sm:$0xc]  ;;  %v1264_v50 = vld [vmem:[%s1715_s1 + $0xd8] sm:$0xff]  ;;  %v1259_v62 = vld [vmem:[%s1715_s1 + $0xb0] sm:$0xff] }
  0x13   : > { %548 = vmatpush.bf16.msra.mxu3 %v1251_v11  ;;  %v204_v31 = vadd.s32 4294967295, %v188_v20  ;;  %v348_v32 = vadd.s32 1, %v188_v20  ;;  %vm205_vm4 = vcmp.ge.s32.totalorder %v203_v21, 0  ;;  %vm351_vm5 = vcmp.lt.s32.totalorder %v347_v22, 4  ;;  %v1245_v43 = vld [vmem:[%s1715_s1 + $0x40] sm:$0xff]  ;;  %v1269_v51 = vld [vmem:[%s1715_s1 + $0xf8] sm:$0xff]  ;;  %vm1448_vm15 = vmor %vm363_vm0, %vm364_vm3 }
  0x14   : > { %292 = vmatpush.bf16.msra.mxu0 %v1242_v12  ;;  %v247_v35 = vshrl.u32 %v243_v29, 16  ;;  %v249_v36 = vshll.u32 %v243_v29, 16  ;;  %v254_v37 = vshll.u32 %v244_v30, 16  ;;  %vm1390_vm9 = vmpackc.low %vm205_vm4, %vm205_vm4  ;;  %v1249_v44 = vld [vmem:[%s1715_s1 + $0x60] sm:$0xff]  ;;  %v571_v45 = vunpack.c.l.b16 %v1395_v39  ;;  %v1263_v8 = vld [vmem:[%s1715_s1 + $0xd0] sm:$0xff] }
  0x15   : > { %338 = vmatpush.bf16.msra.mxu1 %v1238_v13  ;;  %vm206_vm8 = vcmp.ge.s32.totalorder %v204_v31, 0  ;;  %v217_v41 = vsel %vm1390_vm9, %v201_v14, 0  ;;  %vm352_vm11 = vcmp.lt.s32.totalorder %v348_v32, 4  ;;  %v461_v42 = vsel %vm1390_vm9, 65537, %v1292_v23  ;;  %vm359_vm12 = vmpackc.low %vm351_vm5, %vm351_vm5  ;;  %v1268_v9 = vld [vmem:[%s1715_s1 + $0xf0] sm:$0xff]  ;;  %v1254_v10 = vld [vmem:[%s1715_s1 + $0x88] sm:$0xff] }
  0x16   : > { %vm1397_vm10 = vmpackc.low %vm206_vm8, %vm206_vm8  ;;  %449 = vmatpush.bf16.msra.mxu2 %v1246_v25  ;;  %v251_v46 = vrot.slane %v249_v36, 1  ;;  %v256_v47 = vrot.slane %v254_v37, 1  ;;  %v302_v49 = vunpack.c.l.b16 %v217_v41  ;;  %v1425_v53 = vsel %vm359_vm12, 65537, %v1292_v23  ;;  %v346_v17 = vld [vmem:[%s1357_s10] sm:$0xe] }
  0x17   : > { %549 = vmatpush.bf16.msra.mxu3 %v1250_v26  ;;  %v218_v48 = vsel %vm1397_vm10, %v1361_v15, 0  ;;  %vm360_vm13 = vmpackc.low %vm352_vm11, %vm352_vm11  ;;  %v462_v54 = vsel %vm1397_vm10, 65537, %v1292_v23  ;;  %v466_v55 = vrot.slane %v461_v42, 6  ;;  %v366_v58 = vrot.slane %v1425_v53, 7  ;;  %v868_v20 = vld [vmem:[%s1357_s10 + $0x4] sm:$0xe] }
  0x18   : > { %293 = vmatpush.bf16.msra.mxu0 %v1241_v27  ;;  %v303_v52 = vunpack.c.l.b16 %v218_v48  ;;  %v252_v56 = vor.u32 %v251_v46, %v247_v35  ;;  %v1429_v57 = vsel %vm360_vm13, 65537, %v1292_v23  ;;  %v468_v59 = vrot.slane %v462_v54, 6  ;;  %v1258_v23 = vld [vmem:[%s1715_s1 + $0xa8] sm:$0xff]  ;;  %v1257_v48 = vld [vmem:[%s1715_s1 + $0xa0] sm:$0xff]  ;;  %v1273_v54 = vld [vmem:[%s1715_s1 + $0x118] sm:$0xff] }
  0x19   : > { %339 = vmatpush.bf16.msra.mxu1 %v1237_v28  ;;  %v467_v1 = vrot.slane %v466_v55, 4  ;;  %v1454_v3 = vpack.c.b16 %v241_v18, %v571_v45  ;;  %v367_v6 = vrot.slane %v366_v58, 4  ;;  %v368_v7 = vrot.slane %v1429_v57, 7  ;;  %v794_v41 = vld [vmem:[%s1357_s10 + $0x8] sm:$0xf]  ;;  %v1261_v61 = vld [vmem:[%s1715_s1 + $0xc0] sm:$0xff] }
  0x1a   : > { %v304_v63 = vpack.c.b16 %v303_v52, %v302_v49  ;;  %450 = vmatpush.bf16.msra.mxu2 %v1245_v43  ;;  %v257_v4 = vsel %vm1718_vm1, %v252_v56, %v256_v47  ;;  %v1457_v5 = vrot.slane %v468_v59, 4  ;;  %v371_v11 = vunpack.c.l.b16 %v366_v58  ;;  %v1253_v47 = vld [vmem:[%s1715_s1 + $0x80] sm:$0xff] }
  0x1b   : > { %550 = vmatpush.bf16.msra.mxu3 %v1249_v44  ;;  %1036 = vmatmul.msk.bf16.vlgmr.msra.gmra.mxu0 %vm282_vm2, %v257_v4  ;;  %v372_v12 = vunpack.c.h.b16 %v366_v58  ;;  %v469_v13 = vsel %vm1437_vm14, %v467_v1, %v468_v59  ;;  %v471_v14 = vunpack.c.l.b16 %v466_v55  ;;  %vm637_vm0 = vcmask 1042432   ;;  %v1579_v58 = vld [vmem:[%s1357_s10 + $0xc] sm:$0x1] }
  0x1c   : > { %624 = vmatpush.bf16.msrb.mxu0 %v1256_v33  ;;  %1053 = vmatmul.msk.bf16.vlgmr.msra.gmra.mxu1 %vm282_vm2, %v304_v63  ;;  %vm638_vm3 = vcmask 1046532   ;;  %v369_v18 = vsel %vm1448_vm15, %v367_v6, %v368_v7  ;;  %v370_v19 = vrot.slane %v368_v7, 4  ;;  %v472_v21 = vunpack.c.h.b16 %v466_v55  ;;  %v1262_v33 = vld [vmem:[%s1715_s1 + $0xc8] sm:$0xff] }
  0x1d   : > { %721 = vmatpush.bf16.msrb.mxu1 %v1260_v34  ;;  %v478_v22 = vunpack.c.l.b16 %v469_v13  ;;  %vm1481_vm4 = vcmp.ne.s32.totalorder %v371_v11, %v1368_v24  ;;  %vm1486_vm5 = vcmp.ne.s32.totalorder %v372_v12, %v1444_v0  ;;  %v378_v27 = vunpack.c.l.b16 %v369_v18  ;;  %v1267_v34 = vld [vmem:[%s1715_s1 + $0xe8] sm:$0xff] }
  0x1e   : > { %781 = vmatpush.bf16.msrb.mxu2 %v1264_v50  ;;  %v379_v28 = vunpack.c.h.b16 %v369_v18  ;;  %vm377_vm6 = vmpackc.low %vm1486_vm5, %vm1481_vm4  ;;  %v385_v29 = vunpack.c.l.b16 %v370_v19  ;;  %v386_v30 = vunpack.c.h.b16 %v370_v19  ;;  %vm1495_vm8 = vcmp.ne.s32.totalorder %v471_v14, %v1368_v24 }
  0x1f   : > { %856 = vmatpush.bf16.msrb.mxu3 %v1269_v51  ;;  %vm1500_vm11 = vcmp.ne.s32.totalorder %v472_v21, %v1444_v0  ;;  %vm1511_vm12 = vcmp.ne.s32.totalorder %v378_v27, %v1368_v24  ;;  %v392_v37 = vsel %vm377_vm6, %v346_v17, 0  ;;  %v1521_v42 = vsel %vm377_vm6, %v868_v20, 0 }
  0x20   : > { %625 = vmatpush.bf16.msrb.mxu0 %v1255_v60  ;;  %vm1516_vm13 = vcmp.ne.s32.totalorder %v379_v28, %v1444_v0  ;;  %vm477_vm14 = vmpackc.low %vm1500_vm11, %vm1495_vm8  ;;  %v1528_v43 = vrot.slane %v1425_v53, 5  ;;  %vm1535_vm4 = vcmp.ne.s32.totalorder %v385_v29, %v1368_v24  ;;  %vm1540_vm5 = vcmp.ne.s32.totalorder %v386_v30, %v1444_v0  ;;  %v1567_v53 = vld [vmem:[%s1357_s10 + $0x8] sm:$0x7] }
  0x21   : > { %722 = vmatpush.bf16.msrb.mxu1 %v1259_v62  ;;  %vm384_vm15 = vmpackc.low %vm1516_vm13, %vm1511_vm12  ;;  %v407_v46 = vunpack.c.l.b16 %v392_v37  ;;  %v642_v49 = vrot.slane %v1429_v57, 5  ;;  %v479_v51 = vunpack.c.h.b16 %v469_v13  ;;  %vm1562_vm1 = vcmp.ne.s32.totalorder %v478_v22, %v1368_v24  ;;  %v1271_v30 = vld [vmem:[%s1715_s1 + $0x108] sm:$0xff] }
  0x22   : > { %782 = vmatpush.bf16.msrb.mxu2 %v1263_v8  ;;  %vm391_vm6 = vmpackc.low %vm1540_vm5, %vm1535_vm4  ;;  %v393_v50 = vsel %vm384_vm15, %v1361_v15, 0  ;;  %v1586_v59 = vsel %vm384_vm15, %v794_v41, 0  ;;  %v884_v60 = vunpack.c.l.b16 %v1521_v42  ;;  %v485_v1 = vunpack.c.l.b16 %v1457_v5 }
  0x23   : > { %857 = vmatpush.bf16.msrb.mxu3 %v1268_v9  ;;  %v394_v55 = vsel %vm391_vm6, %v1364_v16, 0  ;;  %v408_v56 = vunpack.c.l.b16 %v393_v50  ;;  %v1266_v16 = vld [vmem:[%s1715_s1 + $0xe0] sm:$0xff]  ;;  %v1601_v63 = vsel %vm391_vm6, %v1579_v58, 0  ;;  %vm483_vm12 = vcmp.ne.s32.totalorder %v479_v51, %v1444_v0  ;;  %vm1629_vm11 = vmor %vm637_vm0, %vm638_vm3 }
  0x24   : > { %626 = vmatpush.bf16.msrb.mxu0 %v1254_v10  ;;  %v409_v62 = vunpack.c.l.b16 %v394_v55  ;;  %vm484_vm13 = vmpackc.low %vm483_vm12, %vm1562_vm1  ;;  %v486_v4 = vunpack.c.h.b16 %v1457_v5  ;;  %v492_v6 = vsel %vm477_vm14, %v1395_v39, 0  ;;  %vm512_vm15 = vcmask 1045504   ;;  %v460_v10 = vld [vmem:[%s1357_s10 + $0x8] sm:$0x3]  ;;  %v1272_v39 = vld [vmem:[%s1715_s1 + $0x110] sm:$0xff] }
  0x25   : > { %723 = vmatpush.bf16.msrb.mxu1 %v1258_v23  ;;  %v410_v2 = vpack.c.b16 %v408_v56, %v407_v46  ;;  %v572_v7 = vunpack.c.l.b16 %v1567_v53  ;;  %v885_v9 = vunpack.c.l.b16 %v1586_v59  ;;  %vm1618_vm1 = vcmp.ne.s32.totalorder %v485_v1, %v1368_v24  ;;  %v733_v55 = vld [vmem:[%s1357_s10 + $0x8] sm:$0xf]  ;;  %v1270_v56 = vld [vmem:[%s1715_s1 + $0x100] sm:$0xff] }
  0x26   : > { %783 = vmatpush.bf16.msrb.mxu2 %v1262_v33  ;;  %v411_v8 = vpack.c.b16 %v409_v62, %v409_v62  ;;  %v493_v5 = vsel %vm484_vm13, %v1361_v15, 0  ;;  %vm490_vm8 = vcmp.ne.s32.totalorder %v486_v4, %v1444_v0  ;;  %v507_v13 = vunpack.c.l.b16 %v492_v6  ;;  %v1265_v62 = vld [vmem:[%s1357_s10 + $0x4] sm:$0xff] }
  0x27   : > { %858 = vmatpush.bf16.msrb.mxu3 %v1267_v34  ;;  %v413_v12 = vrot.slane %v410_v2, 1  ;;  %v508_v14 = vunpack.c.l.b16 %v493_v5  ;;  %vm491_vm14 = vmpackc.low %vm490_vm8, %vm1618_vm1  ;;  %v574_v19 = vpack.c.b16 %v572_v7, %v572_v7  ;;  %vm575_vm4 = vsmask.f32 5376 }
  0x28   : > { %627 = vmatpush.bf16.msrb.mxu0 %v1253_v47  ;;  %v414_v18 = vrot.slane %v411_v8, 1  ;;  %v577_v20 = vshrl.u32 %v1454_v3, 16  ;;  %v494_v21 = vsel %vm491_vm14, %v460_v10, 0  ;;  %v580_v23 = vshll.u32 %v1454_v3, 16 }
  0x29   : > { %724 = vmatpush.bf16.msrb.mxu1 %v1257_v48  ;;  %v510_v22 = vpack.c.b16 %v508_v14, %v507_v13  ;;  %v641_v25 = vrot.slane %v1528_v43, 4  ;;  %v509_v27 = vunpack.c.l.b16 %v494_v21  ;;  %v585_v29 = vshrl.u32 %v574_v19, 16  ;;  %v636_v48 = vld [vmem:[%s1357_s10] sm:$0x8] }
  0x2a   : > { %784 = vmatpush.bf16.msrb.mxu2 %v1261_v61  ;;  %v415_v26 = vsel %vm412_vm7, %v413_v12, %v414_v18  ;;  %v579_v28 = vrot.slane %v577_v20, 2  ;;  %v582_v32 = vrot.slane %v580_v23, 3  ;;  %v588_v33 = vshll.u32 %v574_v19, 16 }
  0x2b   : > { %859 = vmatpush.bf16.msrb.mxu3 %v1266_v16  ;;  %1078 = vmatmul.msk.bf16.vlgmr.msra.gmra.mxu2 %vm282_vm2, %v415_v26  ;;  %v513_v31 = vrot.slane %v510_v22, 2  ;;  %v643_v3 = vsel %vm1629_vm11, %v641_v25, %v642_v49  ;;  %v511_v34 = vpack.c.b16 %v509_v27, %v509_v27  ;;  %v587_v35 = vrot.slane %v585_v29, 2 }
  0x2c   : > { %923 = vmatpush.bf16.msra.mxu0 %v1273_v54  ;;  %v644_v36 = vrot.slane %v642_v49, 4  ;;  %v645_v37 = vunpack.c.l.b16 %v1528_v43  ;;  %v583_v41 = vor.u32 %v582_v32, %v579_v28  ;;  %v590_v44 = vrot.slane %v588_v33, 3 }
  0x2d   : > { %v646_v45 = vunpack.c.h.b16 %v1528_v43  ;;  %v652_v46 = vunpack.c.l.b16 %v643_v3  ;;  %v514_v47 = vrot.slane %v511_v34, 2  ;;  %v653_v51 = vunpack.c.h.b16 %v643_v3  ;;  %v1283_v43 = vld [vmem:[%s1716_s2] ss:$0 sm:$0xff] }
  0x2e   : > { %vm1653_vm0 = vcmp.ne.s32.totalorder %v645_v37, %v1368_v24  ;;  %v659_v52 = vunpack.c.l.b16 %v644_v36  ;;  %v591_v57 = vor.u32 %v590_v44, %v587_v35  ;;  %v660_v54 = vunpack.c.h.b16 %v644_v36 }
  0x2f   : > { %vm1658_vm3 = vcmp.ne.s32.totalorder %v646_v45, %v1444_v0  ;;  %vm1663_vm5 = vcmp.ne.s32.totalorder %v652_v46, %v1368_v24  ;;  %v886_v61 = vunpack.c.l.b16 %v1601_v63  ;;  %v515_v16 = vsel %vm512_vm15, %v513_v31, %v514_v47 }
  0x30   : > { %924 = vmatpush.bf16.msra.mxu0 %v1272_v39  ;;  %vm651_vm6 = vmpackc.low %vm1658_vm3, %vm1653_vm0  ;;  %vm657_vm12 = vcmp.ne.s32.totalorder %v653_v51, %v1444_v0  ;;  %vm663_vm13 = vcmp.ne.s32.totalorder %v659_v52, %v1368_v24  ;;  %1103 = vmatmul.msk.bf16.vlgmr.msra.gmra.mxu3 %vm282_vm2, %v515_v16  ;;  %v592_v1 = vsel %vm575_vm4, %v583_v41, %v591_v57  ;;  %v734_v2 = vsel %vm1390_vm9, %v1361_v15, 0 }
  0x31   : > { %vm658_vm1 = vmpackc.low %vm657_vm12, %vm1663_vm5  ;;  %vm664_vm8 = vcmp.ne.s32.totalorder %v660_v54, %v1444_v0  ;;  %v666_v63 = vsel %vm651_vm6, %v636_v48, 0  ;;  %1128 = vmatmul.msk.bf16.vlgmr.msrb.gmra.mxu0 %vm282_vm2, %v592_v1  ;;  %v735_v6 = vsel %vm1397_vm10, %v733_v55, 0  ;;  %v747_v7 = vunpack.c.l.b16 %v734_v2 }
  0x32   : > { %vm665_vm15 = vmpackc.low %vm664_vm8, %vm663_vm13  ;;  %v667_v24 = vsel %vm658_vm1, %v1361_v15, 0  ;;  %v681_v4 = vunpack.c.l.b16 %v666_v63  ;;  %v748_v11 = vunpack.c.l.b16 %v735_v6  ;;  %v810_v0 = vunpack.c.l.b16 %v1579_v58 }
  0x33   : > { %v668_v8 = vsel %vm665_vm15, %v1567_v53, 0  ;;  %v682_v10 = vunpack.c.l.b16 %v667_v24  ;;  %v816_v38 = vshll.u32 %v1265_v62, 16  ;;  %v888_v39 = vpack.c.b16 %v886_v61, %v886_v61 }
  0x34   : > { %925 = vmatpush.bf16.msra.mxu0 %v1271_v30  ;;  %v683_v5 = vunpack.c.l.b16 %v668_v8  ;;  %v812_v13 = vpack.c.b16 %v810_v0, %v810_v0  ;;  %vm686_vm9 = vcmask 1044480   ;;  %v814_v15 = vshrl.u32 %v1265_v62, 16 }
  0x35   : > { %v684_v12 = vpack.c.b16 %v682_v10, %v681_v4  ;;  %v818_v17 = vrot.slane %v816_v38, 1  ;;  %v749_v40 = vpack.c.b16 %v748_v11, %v747_v7  ;;  %v887_v53 = vpack.c.b16 %v885_v9, %v884_v60 }
  0x36   : > { %v685_v14 = vpack.c.b16 %v683_v5, %v683_v5  ;;  %v821_v19 = vshll.u32 %v812_v13, 16  ;;  %v890_v25 = vrot.slane %v888_v39, 1  ;;  %vm1755_vm10 = vsmask.f32 7424 }
  0x37   : > { %v687_v18 = vrot.slane %v684_v12, 3  ;;  %v819_v21 = vor.u32 %v818_v17, %v814_v15  ;;  %v889_v23 = vrot.slane %v887_v53, 1 }
  0x38   : > { %926 = vmatpush.bf16.msra.mxu0 %v1270_v56  ;;  %v688_v20 = vrot.slane %v685_v14, 3  ;;  %v823_v22 = vrot.slane %v821_v19, 1 }
  0x39   : > { %v891_v27 = vsel %vm412_vm7, %v889_v23, %v890_v25 }
  0x3a   : > { %v689_v58 = vsel %vm686_vm9, %v687_v18, %v688_v20  ;;  %v824_v26 = vsel %vm1755_vm10, %v819_v21, %v823_v22 }
  0x3b   : > { %1153 = vmatmul.msk.bf16.vlgmr.msrb.gmra.mxu1 %vm282_vm2, %v689_v58  ;;  %1178 = vmatmul.msk.bf16.vlgmr.msrb.gmra.mxu2 %vm282_vm2, %v749_v40 }
  0x40   : > { %1207 = vmatmul.msk.bf16.vlgmr.msrb.gmra.mxu3 %vm282_vm2, %v824_v26 }
  0x41   : > { %1232 = vmatmul.msk.bf16.vlgmr.msra.gmra.mxu0 %vm282_vm2, %v891_v27  ;;  %vm945_vm2 = vcmask 519168  }
  0x98   : > { %v295_v42 = vpop.f32.mrf.mxu0 }
  0x99   : > { %v341_v60 = vpop.f32.mrf.mxu1 }
  0x9a   : > { %v342_v29 = vadd.f32 %v341_v60, %v295_v42 }
  0xa0   : > { %v297_v59 = vpop.f32.mrf.mxu0 }
  0xa1   : > { %v343_v30 = vpop.f32.mrf.mxu1 }
  0xa2   : > { %v344_v34 = vadd.f32 %v343_v30, %v297_v59 }
  0xae   : > { %v452_v9 = vpop.f32.mrf.mxu2  ;;  %v629_v28 = vpop.f32.mrf.mxu0 }
  0xaf   : > { %v457_v31 = vadd.f32 %v452_v9, %v342_v29 }
  0xb3   : > { %v552_v32 = vpop.f32.mrf.mxu3 }
  0xb4   : > { %v557_v3 = vadd.f32 %v552_v32, %v457_v31 }
  0xb6   : > { %v454_v33 = vpop.f32.mrf.mxu2  ;;  %v631_v35 = vpop.f32.mrf.mxu0  ;;  %v634_v37 = vadd.f32 %v629_v28, %v557_v3 }
  0xb7   : > { %v458_v41 = vadd.f32 %v454_v33, %v344_v34 }
  0xb8   : > { %v726_v36 = vpop.f32.mrf.mxu1 }
  0xb9   : > { %v731_v46 = vadd.f32 %v726_v36, %v634_v37 }
  0xbb   : > { %v554_v44 = vpop.f32.mrf.mxu3 }
  0xbc   : > { %v558_v47 = vadd.f32 %v554_v44, %v458_v41 }
  0xbe   : > { %v786_v45 = vpop.f32.mrf.mxu2  ;;  %v635_v50 = vadd.f32 %v631_v35, %v558_v47  ;;  %v928_v51 = vpop.f32.mrf.mxu0 }
  0xbf   : > { %v791_v48 = vadd.f32 %v786_v45, %v731_v46 }
  0xc0   : > { %v728_v52 = vpop.f32.mrf.mxu1 }
  0xc1   : > { %v732_v55 = vadd.f32 %v728_v52, %v635_v50 }
  0xc3   : > { %v861_v57 = vpop.f32.mrf.mxu3 }
  0xc4   : > { %v866_v49 = vadd.f32 %v861_v57, %v791_v48 }
  0xc6   : > { %v788_v54 = vpop.f32.mrf.mxu2  ;;  %v933_v56 = vadd.f32 %v928_v51, %v866_v49  ;;  %v930_v24 = vpop.f32.mrf.mxu0 }
  0xc7   : > { %v792_v16 = vadd.f32 %v788_v54, %v732_v55 }
  0xc8   : > { %v939_v61 = vadd.f32 %v1283_v43, %v933_v56 }
  0xca   : > { %v941_v62 = vmax.f32 %v939_v61, 0.0 }
  0xcb   : > { %v863_v1 = vpop.f32.mrf.mxu3 }
  0xcc   : > { %v943_v63 = vpack.c.bf16 %v941_v62, %v941_v62  ;;  %v867_v2 = vadd.f32 %v863_v1, %v792_v16 }
  0xce   : > { %946 = vst.msk [vmem:[%s170_s21] sm:$0xf] %vm945_vm2, %v943_v63  ;;  %v934_v4 = vadd.f32 %v930_v24, %v867_v2 }
  0xd0   : > { %v940_v6 = vadd.f32 %v1283_v43, %v934_v4 }
  0xd2   : > { %v942_v7 = vmax.f32 %v940_v6, 0.0 }
  0xd4   : > { %v944_v8 = vpack.c.bf16 %v942_v7, %v942_v7 }
  0xd6   : > { %947 = vst.msk [vmem:[%s170_s21 + $0x4] sm:$0xf] %vm945_vm2, %v944_v8 }
  0xd7 PF: > { %s13_s12 = sadd.s32 1, %s1290_s12  }
  0xd8   : > { %p10_p4 = scmp.ge.s32.totalorder %s13_s12, 4  }
  0xda   :  { %12 = sbr.rel (!%p10_p4) target bundleno = 1 (0x1), region = 70 }

// kernel: resnet_context_forward.23
= control target key start
LH: loop header
LB: loop body
LE: loop exit
PB: predicated region body
PF: predicated region fallthrough
CT: control target
= control target key end

     0   :  { %s729_s12 = smov 0   ;;  %s947_s0 = inlined_call_operand.vmem [shape: bf16[32,256], index: 0, kind: input, shape index: {}]   ;;  %s948_s1 = inlined_call_operand.vmem [shape: bf16[256,192], index: 1, kind: input, shape index: {}]   ;;  %s949_s2 = inlined_call_operand.vmem [shape: f32[1,192], index: 2, kind: input, shape index: {}]   ;;  %s950_s3 = inlined_call_operand.vmem [shape: f32[32,192], index: 3, kind: output, shape index: {}]  }
   0x1 LB: > { %s508_s13 = sadd.s32 4294967295, %s707_s12   ;;  %p512_p0 = scmp.ge.s32.totalorder %s707_s12, 1  ;;  %s707_s12 = sphi %s729_s12, %s13_s12  }
   0x2   : > { %p139_p1 = scmp.lt.s32.totalorder %s707_s12, 3 }
   0x4   : > { %p140_p2 = pnand %p512_p0, %p139_p1 }
   0x5   : > { %s513_s22 = sshll.u32 (!%p140_p2), %s508_s13, 1 }
   0x6   : > { %143 = sbr.rel (%p140_p2) target bundleno = 191 (0xbf), region = 32  ;;  %p166_p3 = scmp.lt.s32.totalorder (!%p140_p2), %s513_s22, 3 }
   0xb   : > { %v585_v0 = vld [vmem:[%s948_s1 + $0x70] sm:$0xf]  ;;  %v676_v1 = vld [vmem:[%s948_s1 + $0x74] sm:$0xf0]  ;;  %v675_v5 = vld [vmem:[%s948_s1 + $0x74] sm:$0xf] }
   0xc   : > { %v649_v2 = vld [vmem:[%s948_s1 + $0xf0] sm:$0xf]  ;;  %v586_v3 = vor.u32 %v676_v1, %v585_v0  ;;  %v692_v4 = vld [vmem:[%s948_s1 + $0xf4] sm:$0xf0]  ;;  %v587_v6 = vld [vmem:[%s948_s1 + $0x78] sm:$0xf0] }
   0xd   : > { %v650_v7 = vor.u32 %v692_v4, %v649_v2  ;;  %v590_v8 = vor.u32 %v675_v5, %v587_v6  ;;  %v691_v9 = vld [vmem:[%s948_s1 + $0xf4] sm:$0xf]  ;;  %v651_v10 = vld [vmem:[%s948_s1 + $0xf8] sm:$0xf0]  ;;  %v577_v11 = vld [vmem:[%s948_s1 + $0x60] sm:$0xf] }
   0xe   : > { %389 = vmatpush.bf16.msra.mxu0 %v586_v3  ;;  %v654_v12 = vor.u32 %v691_v9, %v651_v10  ;;  %v674_v13 = vld [vmem:[%s948_s1 + $0x64] sm:$0xf0]  ;;  %v641_v14 = vld [vmem:[%s948_s1 + $0xe0] sm:$0xf]  ;;  %v673_v18 = vld [vmem:[%s948_s1 + $0x64] sm:$0xf] }
   0xf   : > { %v690_v15 = vld [vmem:[%s948_s1 + $0xe4] sm:$0xf0]  ;;  %403 = vmatpush.bf16.msra.mxu1 %v650_v7  ;;  %417 = vmatpush.bf16.msra.mxu2 %v590_v8  ;;  %v578_v16 = vor.u32 %v674_v13, %v577_v11  ;;  %v579_v19 = vld [vmem:[%s948_s1 + $0x68] sm:$0xf0]  ;;  %v689_v20 = vld [vmem:[%s948_s1 + $0xe4] sm:$0xf] }
  0x10   : > { %v642_v17 = vor.u32 %v690_v15, %v641_v14  ;;  %431 = vmatpush.bf16.msra.mxu3 %v654_v12  ;;  %v582_v21 = vor.u32 %v673_v18, %v579_v19  ;;  %v643_v22 = vld [vmem:[%s948_s1 + $0xe8] sm:$0xf0]  ;;  %v569_v23 = vld [vmem:[%s948_s1 + $0x50] sm:$0xf]  ;;  %v672_v24 = vld [vmem:[%s948_s1 + $0x54] sm:$0xf0] }
  0x11   : > { %v646_v25 = vor.u32 %v689_v20, %v643_v22  ;;  %v633_v26 = vld [vmem:[%s948_s1 + $0xd0] sm:$0xf]  ;;  %v688_v27 = vld [vmem:[%s948_s1 + $0xd4] sm:$0xf0]  ;;  %v671_v28 = vld [vmem:[%s948_s1 + $0x54] sm:$0xf]  ;;  %v570_v29 = vor.u32 %v672_v24, %v569_v23 }
  0x12   : > { %390 = vmatpush.bf16.msra.mxu0 %v578_v16  ;;  %v571_v30 = vld [vmem:[%s948_s1 + $0x58] sm:$0xf0]  ;;  %v687_v31 = vld [vmem:[%s948_s1 + $0xd4] sm:$0xf]  ;;  %v634_v33 = vor.u32 %v688_v27, %v633_v26  ;;  %v561_v35 = vld [vmem:[%s948_s1 + $0x40] sm:$0xf] }
  0x13   : > { %v635_v32 = vld [vmem:[%s948_s1 + $0xd8] sm:$0xf0]  ;;  %404 = vmatpush.bf16.msra.mxu1 %v642_v17  ;;  %418 = vmatpush.bf16.msra.mxu2 %v582_v21  ;;  %v574_v34 = vor.u32 %v671_v28, %v571_v30  ;;  %v670_v36 = vld [vmem:[%s948_s1 + $0x44] sm:$0xf0]  ;;  %v625_v37 = vld [vmem:[%s948_s1 + $0xc0] sm:$0xf] }
  0x14   : > { %432 = vmatpush.bf16.msra.mxu3 %v646_v25  ;;  %v638_v38 = vor.u32 %v687_v31, %v635_v32  ;;  %v686_v39 = vld [vmem:[%s948_s1 + $0xc4] sm:$0xf0]  ;;  %v669_v40 = vld [vmem:[%s948_s1 + $0x44] sm:$0xf]  ;;  %v563_v41 = vld [vmem:[%s948_s1 + $0x48] sm:$0xf0]  ;;  %v562_v44 = vor.u32 %v670_v36, %v561_v35 }
  0x15   : > { %v685_v42 = vld [vmem:[%s948_s1 + $0xc4] sm:$0xf]  ;;  %v627_v43 = vld [vmem:[%s948_s1 + $0xc8] sm:$0xf0]  ;;  %v626_v45 = vor.u32 %v686_v39, %v625_v37  ;;  %v566_v46 = vor.u32 %v669_v40, %v563_v41  ;;  %v553_v47 = vld [vmem:[%s948_s1 + $0x30] sm:$0xf] }
  0x16   : > { %391 = vmatpush.bf16.msra.mxu0 %v570_v29  ;;  %v668_v48 = vld [vmem:[%s948_s1 + $0x34] sm:$0xf0]  ;;  %v617_v49 = vld [vmem:[%s948_s1 + $0xb0] sm:$0xf]  ;;  %v630_v50 = vor.u32 %v685_v42, %v627_v43  ;;  %v667_v52 = vld [vmem:[%s948_s1 + $0x34] sm:$0xf] }
  0x17   : > { %405 = vmatpush.bf16.msra.mxu1 %v634_v33  ;;  %419 = vmatpush.bf16.msra.mxu2 %v574_v34  ;;  %v684_v51 = vld [vmem:[%s948_s1 + $0xb4] sm:$0xf0]  ;;  %v555_v53 = vld [vmem:[%s948_s1 + $0x38] sm:$0xf0]  ;;  %v683_v54 = vld [vmem:[%s948_s1 + $0xb4] sm:$0xf]  ;;  %v554_v56 = vor.u32 %v668_v48, %v553_v47 }
  0x18   : > { %433 = vmatpush.bf16.msra.mxu3 %v638_v38  ;;  %v619_v55 = vld [vmem:[%s948_s1 + $0xb8] sm:$0xf0]  ;;  %v618_v57 = vor.u32 %v684_v51, %v617_v49  ;;  %v558_v58 = vor.u32 %v667_v52, %v555_v53  ;;  %v545_v59 = vld [vmem:[%s948_s1 + $0x20] sm:$0xf]  ;;  %v666_v60 = vld [vmem:[%s948_s1 + $0x24] sm:$0xf0] }
  0x19   : > { %v609_v61 = vld [vmem:[%s948_s1 + $0xa0] sm:$0xf]  ;;  %v622_v62 = vor.u32 %v683_v54, %v619_v55  ;;  %v682_v63 = vld [vmem:[%s948_s1 + $0xa4] sm:$0xf0]  ;;  %v665_v0 = vld [vmem:[%s948_s1 + $0x24] sm:$0xf]  ;;  %v546_v4 = vor.u32 %v666_v60, %v545_v59 }
  0x1a   : > { %392 = vmatpush.bf16.msra.mxu0 %v562_v44  ;;  %v547_v1 = vld [vmem:[%s948_s1 + $0x28] sm:$0xf0]  ;;  %v681_v2 = vld [vmem:[%s948_s1 + $0xa4] sm:$0xf]  ;;  %v537_v5 = vld [vmem:[%s948_s1 + $0x10] sm:$0xf]  ;;  %v610_v6 = vor.u32 %v682_v63, %v609_v61 }
  0x1b   : > { %406 = vmatpush.bf16.msra.mxu1 %v626_v45  ;;  %420 = vmatpush.bf16.msra.mxu2 %v566_v46  ;;  %v611_v3 = vld [vmem:[%s948_s1 + $0xa8] sm:$0xf0]  ;;  %v550_v7 = vor.u32 %v665_v0, %v547_v1  ;;  %v664_v8 = vld [vmem:[%s948_s1 + $0x14] sm:$0xf0]  ;;  %v601_v9 = vld [vmem:[%s948_s1 + $0x90] sm:$0xf] }
  0x1c   : > { %434 = vmatpush.bf16.msra.mxu3 %v630_v50  ;;  %v680_v10 = vld [vmem:[%s948_s1 + $0x94] sm:$0xf0]  ;;  %v614_v11 = vor.u32 %v681_v2, %v611_v3  ;;  %v663_v12 = vld [vmem:[%s948_s1 + $0x14] sm:$0xf]  ;;  %v539_v13 = vld [vmem:[%s948_s1 + $0x18] sm:$0xf0]  ;;  %v538_v16 = vor.u32 %v664_v8, %v537_v5 }
  0x1d   : > { %v679_v14 = vld [vmem:[%s948_s1 + $0x94] sm:$0xf]  ;;  %v603_v15 = vld [vmem:[%s948_s1 + $0x98] sm:$0xf0]  ;;  %v529_v17 = vld [vmem:[%s948_s1] sm:$0xf]  ;;  %v602_v18 = vor.u32 %v680_v10, %v601_v9  ;;  %v542_v19 = vor.u32 %v663_v12, %v539_v13 }
  0x1e   : > { %393 = vmatpush.bf16.msra.mxu0 %v554_v56  ;;  %v662_v20 = vld [vmem:[%s948_s1 + $0x4] sm:$0xf0]  ;;  %v593_v21 = vld [vmem:[%s948_s1 + $0x80] sm:$0xf]  ;;  %s952_s22 = smov (!%p166_p3, %s513_s22), 3  ;;  %v606_v22 = vor.u32 %v679_v14, %v603_v15  ;;  %vm446_vm0 = vcmask 523264  }
  0x1f   : > { %407 = vmatpush.bf16.msra.mxu1 %v618_v57  ;;  %421 = vmatpush.bf16.msra.mxu2 %v558_v58  ;;  %v678_v23 = vld [vmem:[%s948_s1 + $0x84] sm:$0xf0]  ;;  %v661_v24 = vld [vmem:[%s948_s1 + $0x4] sm:$0xf]  ;;  %v531_v25 = vld [vmem:[%s948_s1 + $0x8] sm:$0xf0]  ;;  %v530_v28 = vor.u32 %v662_v20, %v529_v17 }
  0x20   : > { %435 = vmatpush.bf16.msra.mxu3 %v622_v62  ;;  %v677_v26 = vld [vmem:[%s948_s1 + $0x84] sm:$0xf]  ;;  %v595_v27 = vld [vmem:[%s948_s1 + $0x88] sm:$0xf0]  ;;  %s657_s17 = sshll.u32 %s952_s22, 3  ;;  %v594_v29 = vor.u32 %v678_v23, %v593_v21  ;;  %v534_v30 = vor.u32 %v661_v24, %v531_v25  ;;  %s658_s24 = sshll.u32 %s952_s22, 4 }
  0x21   : > { %s170_s20 = scalar_lea.vmem %s947_s0, %s657_s17  ;;  %v598_v34 = vor.u32 %v677_v26, %v595_v27  ;;  %v213_v38 = vld [vmem:[%s949_s2] sm:$0x3]  ;;  %s177_s27 = scalar_lea.vmem %s950_s3, %s658_s24 }
  0x22   : > { %394 = vmatpush.bf16.msra.mxu0 %v546_v4  ;;  %v521_v31 = vld [vmem:[%s170_s20] sm:$0xf]  ;;  %v660_v32 = vld [vmem:[%s170_s20 + $0x4] sm:$0xf0]  ;;  %v659_v33 = vld [vmem:[%s170_s20 + $0x4] sm:$0xf] }
  0x23   : > { %408 = vmatpush.bf16.msra.mxu1 %v610_v6  ;;  %422 = vmatpush.bf16.msra.mxu2 %v550_v7  ;;  %v523_v35 = vld [vmem:[%s170_s20 + $0x8] sm:$0xf0]  ;;  %v522_v36 = vor.u32 %v660_v32, %v521_v31  ;;  %v215_v39 = vperm.slane %v213_v38, 0  ;;  %v216_v44 = vperm.slane %v213_v38, 1 }
  0x24   : > { %436 = vmatpush.bf16.msra.mxu3 %v614_v11  ;;  %v526_v37 = vor.u32 %v659_v33, %v523_v35 }
  0x26   : > { %395 = vmatpush.bf16.msra.mxu0 %v538_v16 }
  0x27   : > { %409 = vmatpush.bf16.msra.mxu1 %v602_v18  ;;  %423 = vmatpush.bf16.msra.mxu2 %v542_v19 }
  0x28   : > { %437 = vmatpush.bf16.msra.mxu3 %v606_v22 }
  0x2a   : > { %396 = vmatpush.bf16.msra.mxu0 %v530_v28 }
  0x2b   : > { %410 = vmatpush.bf16.msra.mxu1 %v594_v29  ;;  %424 = vmatpush.bf16.msra.mxu2 %v534_v30 }
  0x2c   : > { %438 = vmatpush.bf16.msra.mxu3 %v598_v34 }
  0x2d   : > { %397 = vmatmul.bf16.vlgmr.msra.gmra.mxu0 %v522_v36 }
  0x2e   : > { %411 = vmatmul.bf16.vlgmr.msra.gmra.mxu1 %v526_v37  ;;  %425 = vmatmul.bf16.vlgmr.msra.gmra.mxu2 %v522_v36 }
  0x2f   : > { %439 = vmatmul.bf16.vlgmr.msra.gmra.mxu3 %v526_v37 }
  0xaa   : > { %v398_v40 = vpop.f32.mrf.mxu0 }
  0xab   : > { %v399_v41 = vadd.f32 %v398_v40, %v215_v39  ;;  %v412_v42 = vpop.f32.mrf.mxu1 }
  0xad   : > { %v413_v43 = vadd.f32 %v412_v42, %v399_v41 }
  0xaf   : > { %445 = vst [vmem:[%s177_s27] sm:$0xff] %v413_v43 }
  0xb1   : > { %v426_v45 = vpop.f32.mrf.mxu2 }
  0xb2   : > { %v427_v46 = vadd.f32 %v426_v45, %v216_v44  ;;  %v440_v47 = vpop.f32.mrf.mxu3  ;;  %v400_v48 = vpop.f32.mrf.mxu0 }
  0xb3   : > { %v401_v49 = vadd.f32 %v400_v48, %v215_v39  ;;  %v414_v51 = vpop.f32.mrf.mxu1 }
  0xb4   : > { %v441_v50 = vadd.f32 %v440_v47, %v427_v46 }
  0xb5   : > { %v415_v52 = vadd.f32 %v414_v51, %v401_v49 }
  0xb6   : > { %447 = vst.msk [vmem:[%s177_s27 + $0x8] sm:$0xff] %vm446_vm0, %v441_v50 }
  0xb7   : > { %448 = vst [vmem:[%s177_s27 + $0x10] sm:$0xff] %v415_v52 }
  0xb9   : > { %v428_v53 = vpop.f32.mrf.mxu2 }
  0xba   : > { %v429_v54 = vadd.f32 %v428_v53, %v216_v44  ;;  %v442_v55 = vpop.f32.mrf.mxu3 }
  0xbc   : > { %v443_v56 = vadd.f32 %v442_v55, %v429_v54 }
  0xbe   : > { %449 = vst.msk [vmem:[%s177_s27 + $0x18] sm:$0xff] %vm446_vm0, %v443_v56 }
  0xbf PF: > { %s13_s12 = sadd.s32 1, %s707_s12  }
  0xc0   : > { %p10_p4 = scmp.ge.s32.totalorder %s13_s12, 4  }
  0xc2   :  { %12 = sbr.rel (!%p10_p4) target bundleno = 1 (0x1), region = 62 }

</bundles_post_ra>
